<compile_context>
chip_gen: v7x
topology: tpu7x:2x2x1
jax: 0.10.0
libtpu: 0.0.40
codegen_flags: <defaults>
</compile_context>

<pallas_src>
import functools

import jax
import jax.numpy as jnp
from jax.experimental import pallas as pl
from jax.experimental.pallas import tpu as pltpu

BN_EPS = 1e-5
LANE = 128
SUBLANE = 8
VMEM_LIMIT = 64 * 1024 * 1024


def _round_up(x, m):
    return (x + m - 1) // m * m


# ----------------------------- Pallas kernels --------------------------------
def conv_relu_stats_kernel(p_ref, w_ref, b_ref, y_ref, sum_ref, sq_ref,
                           *, m_valid, block_m):
    """Pass 1: (im2col matmul) -> bias -> ReLU, plus per-tile channel stats.

    p_ref:   (TM, K)       bf16 im2col patches for this M tile
    w_ref:   (K, Coutp)    bf16 conv weights (resident across the grid)
    b_ref:   (1, Coutp)    f32 conv bias
    y_ref:   (TM, Coutp)   f32 pre-BN activation tile (output)
    sum_ref: (8, Coutp)    f32 per-tile partial sum (row-broadcast)
    sq_ref:  (8, Coutp)    f32 per-tile partial sum of squares (row-broadcast)
    """
    y = jnp.dot(p_ref[...], w_ref[...], preferred_element_type=jnp.float32)
    y = jnp.maximum(y + b_ref[...], 0.0)                       # bias + ReLU
    y_ref[...] = y

    # Exclude zero-padded M rows from the batch statistics (last tile only).
    if m_valid % block_m != 0:
        row = (pl.program_id(0) * block_m
               + jax.lax.broadcasted_iota(jnp.int32, (block_m, 1), 0))
        y = jnp.where(row < m_valid, y, 0.0)

    sum_ref[...] = jnp.broadcast_to(jnp.sum(y, axis=0, keepdims=True),
                                    sum_ref.shape)
    sq_ref[...] = jnp.broadcast_to(jnp.sum(y * y, axis=0, keepdims=True),
                                   sq_ref.shape)


def bn_affine_kernel(y_ref, a_ref, b_ref, o_ref):
    """Pass 2: per-channel affine (folded BatchNorm)  out = y * a + b."""
    o_ref[...] = (y_ref[...] * a_ref[...] + b_ref[...]).astype(o_ref.dtype)


# ------------------------------ stage wrapper ---------------------------------
def im2col_3x3_pad1(x_nhwc):
    """Extract 3x3 patches (padding=1, stride=1) -> (N*H*W, 9*C)."""
    n, h, w, c = x_nhwc.shape
    xp = jnp.pad(x_nhwc, ((0, 0), (1, 1), (1, 1), (0, 0)))
    cols = [xp[:, ky:ky + h, kx:kx + w, :] for ky in range(3) for kx in range(3)]
    return jnp.concatenate(cols, axis=-1).reshape(n * h * w, 9 * c)


def conv_relu_bn_stage(x_nhwc, w_hwio, bias, gamma, beta, *,
                       block_m=512, out_dtype=jnp.float32):
    """One (conv3x3 -> ReLU -> BatchNorm2d) stage.  NHWC in / NHWC out."""
    n, h, w, cin = x_nhwc.shape
    cout = w_hwio.shape[-1]
    coutp = _round_up(cout, LANE)           # lane-dense output channels
    k = 9 * cin
    m = n * h * w

    tm = min(_round_up(block_m, SUBLANE), _round_up(m, SUBLANE))
    grid_m = pl.cdiv(m, tm)
    m_pad = grid_m * tm

    # im2col patches in bf16 (MXU operand dtype); pad M up to the grid.
    patches = im2col_3x3_pad1(x_nhwc.astype(jnp.bfloat16))
    if m_pad != m:
        patches = jnp.pad(patches, ((0, m_pad - m), (0, 0)))

    # Weights / per-channel params, channel-padded to Coutp.
    w_mat = jnp.pad(w_hwio.reshape(k, cout).astype(jnp.bfloat16),
                    ((0, 0), (0, coutp - cout)))
    b_p = jnp.pad(bias.reshape(1, cout).astype(jnp.float32),
                  ((0, 0), (0, coutp - cout)))
    g_p = jnp.pad(gamma.reshape(1, cout).astype(jnp.float32),
                  ((0, 0), (0, coutp - cout)))
    be_p = jnp.pad(beta.reshape(1, cout).astype(jnp.float32),
                   ((0, 0), (0, coutp - cout)))

    # ---- pass 1: conv + bias + ReLU + partial BN stats (gridded over M) ----
    pass1_cost = pl.CostEstimate(
        flops=int(2 * m_pad * k * coutp),
        transcendentals=0,
        bytes_accessed=int(patches.size * 2 + w_mat.size * 2 + coutp * 4
                           + m_pad * coutp * 4 + 2 * grid_m * 8 * coutp * 4))
    kern1 = functools.partial(conv_relu_stats_kernel, m_valid=m, block_m=tm)
    y, psum, psq = pl.pallas_call(
        kern1,
        out_shape=(jax.ShapeDtypeStruct((m_pad, coutp), jnp.float32),
                   jax.ShapeDtypeStruct((grid_m * 8, coutp), jnp.float32),
                   jax.ShapeDtypeStruct((grid_m * 8, coutp), jnp.float32)),
        grid=(grid_m,),
        in_specs=[pl.BlockSpec((tm, k), lambda i: (i, 0)),
                  pl.BlockSpec((k, coutp), lambda i: (0, 0)),
                  pl.BlockSpec((1, coutp), lambda i: (0, 0))],
        out_specs=(pl.BlockSpec((tm, coutp), lambda i: (i, 0)),
                   pl.BlockSpec((8, coutp), lambda i: (i, 0)),
                   pl.BlockSpec((8, coutp), lambda i: (i, 0))),
        compiler_params=pltpu.CompilerParams(
            dimension_semantics=("parallel",),
            vmem_limit_bytes=VMEM_LIMIT),
        cost_estimate=pass1_cost,
    )(patches, w_mat, b_p)

    # ---- tiny stats reduction + BN affine coefficients (plain JAX) ----
    s1 = jnp.sum(psum[::8], axis=0)                     # (coutp,)
    s2 = jnp.sum(psq[::8], axis=0)
    mean = s1 / float(m)
    var = jnp.maximum(s2 / float(m) - mean * mean, 0.0)  # biased batch variance
    scale = g_p * jax.lax.rsqrt(var + BN_EPS)            # (1, coutp)
    shift = be_p - mean[None, :] * scale                 # (1, coutp)

    # ---- pass 2: apply the BN affine, tiled over M ----
    out_itemsize = jnp.dtype(out_dtype).itemsize
    pass2_cost = pl.CostEstimate(
        flops=int(2 * m_pad * coutp),
        transcendentals=0,
        bytes_accessed=int(m_pad * coutp * 4 + m_pad * coutp * out_itemsize))
    out = pl.pallas_call(
        bn_affine_kernel,
        out_shape=jax.ShapeDtypeStruct((m_pad, coutp), out_dtype),
        grid=(grid_m,),
        in_specs=[pl.BlockSpec((tm, coutp), lambda i: (i, 0)),
                  pl.BlockSpec((1, coutp), lambda i: (0, 0)),
                  pl.BlockSpec((1, coutp), lambda i: (0, 0))],
        out_specs=pl.BlockSpec((tm, coutp), lambda i: (i, 0)),
        compiler_params=pltpu.CompilerParams(
            dimension_semantics=("parallel",),
            vmem_limit_bytes=VMEM_LIMIT),
        cost_estimate=pass2_cost,
    )(y, scale, shift)

    return out[:m, :cout].reshape(n, h, w, cout)


def convolution_block_forward(x_nchw, params, *, block_m=512):
    """Full ConvolutionBlock forward.  Input/output are NCHW like PyTorch."""
    x = jnp.transpose(x_nchw, (0, 2, 3, 1))             # -> NHWC

    # Stage 1: conv1 -> ReLU -> bnorm1 (intermediate emitted in bf16).
    y1 = conv_relu_bn_stage(x, params["w1"], params["b1"],
                            params["g1"], params["be1"],
                            block_m=block_m, out_dtype=jnp.bfloat16)
    # Stage 2: conv2 -> ReLU -> bnorm2 (final output f32).
    y2 = conv_relu_bn_stage(y1, params["w2"], params["b2"],
                            params["g2"], params["be2"],
                            block_m=block_m, out_dtype=jnp.float32)

    return jnp.transpose(y2, (0, 3, 1, 2))               # -> NCHW


# ------------------------ pure-JAX reference (check) --------------------------
def reference_forward(x_nchw, params):
    x = jnp.transpose(x_nchw, (0, 2, 3, 1))

    def conv(x, w_hwio, b):
        y = jax.lax.conv_general_dilated(
            x.astype(jnp.bfloat16), w_hwio.astype(jnp.bfloat16),
            window_strides=(1, 1), padding=((1, 1), (1, 1)),
            dimension_numbers=("NHWC", "HWIO", "NHWC"),
            preferred_element_type=jnp.float32)
        return y + b

    def bn(x, g, be):
        mean = jnp.mean(x, axis=(0, 1, 2), keepdims=True)
        var = jnp.mean((x - mean) ** 2, axis=(0, 1, 2), keepdims=True)
        return (x - mean) * jax.lax.rsqrt(var + BN_EPS) * g + be

    y = jnp.maximum(conv(x, params["w1"], params["b1"][0]), 0.0)
    y = bn(y, params["g1"][0], params["be1"][0])
    y = jnp.maximum(conv(y, params["w2"], params["b2"][0]), 0.0)
    y = bn(y, params["g2"][0], params["be2"][0])
    return jnp.transpose(y, (0, 3, 1, 2))


# ------------------------------- main ----------------------------------------
def init_params(key, in_channels, out_channels):
    k1, k2, k3, k4 = jax.random.split(key, 4)
    fan1 = in_channels * 9
    fan2 = out_channels * 9
    # Deterministic synthetic init (kaiming-style scale); HWIO weight layout.
    return {
        "w1": jax.random.normal(k1, (3, 3, in_channels, out_channels),
                                jnp.float32) * (2.0 / fan1) ** 0.5,
        "b1": jax.random.normal(k2, (1, out_channels), jnp.float32) * 0.1,
        "g1": jnp.ones((1, out_channels), jnp.float32),     # BN gamma (torch init)
        "be1": jnp.zeros((1, out_channels), jnp.float32),   # BN beta  (torch init)
        "w2": jax.random.normal(k3, (3, 3, out_channels, out_channels),
                                jnp.float32) * (2.0 / fan2) ** 0.5,
        "b2": jax.random.normal(k4, (1, out_channels), jnp.float32) * 0.1,
        "g2": jnp.ones((1, out_channels), jnp.float32),
        "be2": jnp.zeros((1, out_channels), jnp.float32),
    }


if __name__ == "__main__":
    key = jax.random.PRNGKey(0)
    kx, kp = jax.random.split(key)

    batch, in_channels, out_channels, hw = 2, 4, 8, 16
    x = jax.random.normal(kx, (batch, in_channels, hw, hw), jnp.float32)  # NCHW
    params = init_params(kp, in_channels, out_channels)

    # block_m=192 at this size exercises both the M grid (3 steps) and the
    # masked last-tile statistics path (M=512 is not a multiple of 192).
    fwd = jax.jit(functools.partial(convolution_block_forward, block_m=192))
    out = jax.block_until_ready(fwd(x, params))
    assert out.shape == (batch, out_channels, hw, hw), out.shape

    ref = jax.block_until_ready(reference_forward(x, params))
    max_err = float(jnp.max(jnp.abs(out - ref)))
    assert jnp.allclose(out, ref, atol=5e-3, rtol=5e-3), max_err

    print("KERNEL_OK")
</pallas_src>

<mosaic_0001>
module attributes {stable_mosaic.version = 11 : i64} {
  func.func @bn_affine_kernel(%arg0: i32, %arg1: memref<192x128xf32, #tpu.memory_space<vmem>>, %arg2: memref<1x128xf32, #tpu.memory_space<vmem>>, %arg3: memref<1x128xf32, #tpu.memory_space<vmem>>, %arg4: memref<192x128xbf16, #tpu.memory_space<vmem>>) attributes {dimension_semantics = [#tpu.dimension_semantics<parallel>], iteration_bounds = array<i64: 3>, scalar_prefetch = 0 : i64, scratch_operands = 0 : i64, tpu.core_type = #tpu.core_type<tc>, window_params = [{transform_indices = @transform_0, window_bounds = array<i64: 192, 128>}, {pipeline_mode = #tpu.pipeline_mode<synchronous>, transform_indices = @transform_1, window_bounds = array<i64: 1, 128>}, {pipeline_mode = #tpu.pipeline_mode<synchronous>, transform_indices = @transform_2, window_bounds = array<i64: 1, 128>}, {transform_indices = @transform_3, window_bounds = array<i64: 192, 128>}]} {
    %c0 = arith.constant 0 : index
    %c0_0 = arith.constant 0 : index
    %0 = vector.load %arg1[%c0, %c0_0] : memref<192x128xf32, #tpu.memory_space<vmem>>, vector<192x128xf32>
    %c0_1 = arith.constant 0 : index
    %c0_2 = arith.constant 0 : index
    %1 = vector.load %arg2[%c0_1, %c0_2] : memref<1x128xf32, #tpu.memory_space<vmem>>, vector<1x128xf32>
    %2 = vector.broadcast %1 : vector<1x128xf32> to vector<192x128xf32>
    %3 = arith.mulf %0, %2 : vector<192x128xf32>
    %c0_3 = arith.constant 0 : index
    %c0_4 = arith.constant 0 : index
    %4 = vector.load %arg3[%c0_3, %c0_4] : memref<1x128xf32, #tpu.memory_space<vmem>>, vector<1x128xf32>
    %5 = vector.broadcast %4 : vector<1x128xf32> to vector<192x128xf32>
    %6 = arith.addf %3, %5 : vector<192x128xf32>
    %7 = arith.truncf %6 : vector<192x128xf32> to vector<192x128xbf16>
    %c0_5 = arith.constant 0 : index
    %c0_6 = arith.constant 0 : index
    %8 = vector.load %arg4[%c0_5, %c0_6] : memref<192x128xbf16, #tpu.memory_space<vmem>>, vector<192x128xbf16>
    tpu.vector_store %arg4[%c0_5, %c0_6], %7 {strides = array<i32>} : memref<192x128xbf16, #tpu.memory_space<vmem>>, vector<192x128xbf16>,
    return
  }
  func.func @transform_0(%arg0: i32) -> (i32, i32) {
    %c0_i32 = arith.constant 0 : i32
    %c0_i32_0 = arith.constant 0 : i32
    return %arg0, %c0_i32 : i32, i32
  }
  func.func @transform_1(%arg0: i32) -> (i32, i32) {
    %c0_i32 = arith.constant 0 : i32
    %c0_i32_0 = arith.constant 0 : i32
    %c0_i32_1 = arith.constant 0 : i32
    return %c0_i32, %c0_i32_0 : i32, i32
  }
  func.func @transform_2(%arg0: i32) -> (i32, i32) {
    %c0_i32 = arith.constant 0 : i32
    %c0_i32_0 = arith.constant 0 : i32
    %c0_i32_1 = arith.constant 0 : i32
    return %c0_i32, %c0_i32_0 : i32, i32
  }
  func.func @transform_3(%arg0: i32) -> (i32, i32) {
    %c0_i32 = arith.constant 0 : i32
    %c0_i32_0 = arith.constant 0 : i32
    return %arg0, %c0_i32 : i32, i32
  }
}

module attributes {stable_mosaic.version = 11 : i64} {
  func.func @conv_relu_stats_kernel(%arg0: i32, %arg1: memref<192x36xbf16, #tpu.memory_space<vmem>>, %arg2: memref<36x128xbf16, #tpu.memory_space<vmem>>, %arg3: memref<1x128xf32, #tpu.memory_space<vmem>>, %arg4: memref<192x128xf32, #tpu.memory_space<vmem>>, %arg5: memref<8x128xf32, #tpu.memory_space<vmem>>, %arg6: memref<8x128xf32, #tpu.memory_space<vmem>>) attributes {dimension_semantics = [#tpu.dimension_semantics<parallel>], iteration_bounds = array<i64: 3>, scalar_prefetch = 0 : i64, scratch_operands = 0 : i64, tpu.core_type = #tpu.core_type<tc>, window_params = [{transform_indices = @transform_0, window_bounds = array<i64: 192, 36>}, {pipeline_mode = #tpu.pipeline_mode<synchronous>, transform_indices = @transform_1, window_bounds = array<i64: 36, 128>}, {pipeline_mode = #tpu.pipeline_mode<synchronous>, transform_indices = @transform_2, window_bounds = array<i64: 1, 128>}, {transform_indices = @transform_3, window_bounds = array<i64: 192, 128>}, {transform_indices = @transform_4, window_bounds = array<i64: 8, 128>}, {transform_indices = @transform_5, window_bounds = array<i64: 8, 128>}]} {
    %c0 = arith.constant 0 : index
    %c0_0 = arith.constant 0 : index
    %0 = vector.load %arg1[%c0, %c0_0] : memref<192x36xbf16, #tpu.memory_space<vmem>>, vector<192x36xbf16>
    %c0_1 = arith.constant 0 : index
    %c0_2 = arith.constant 0 : index
    %1 = vector.load %arg2[%c0_1, %c0_2] : memref<36x128xbf16, #tpu.memory_space<vmem>>, vector<36x128xbf16>
    %cst = arith.constant dense<0.000000e+00> : vector<192x128xf32>
    %2 = tpu.matmul %0, %1, %cst {dimension_numbers = #tpu.dot_dimension_numbers<[1], [0], [0], [1], [0, 0, 1, 1], [], []>} : vector<192x36xbf16>, vector<36x128xbf16>, vector<192x128xf32> -> vector<192x128xf32>
    %c0_3 = arith.constant 0 : index
    %c0_4 = arith.constant 0 : index
    %3 = vector.load %arg3[%c0_3, %c0_4] : memref<1x128xf32, #tpu.memory_space<vmem>>, vector<1x128xf32>
    %4 = vector.broadcast %3 : vector<1x128xf32> to vector<192x128xf32>
    %5 = arith.addf %2, %4 : vector<192x128xf32>
    %cst_5 = arith.constant 0.000000e+00 : f32
    %6 = vector.broadcast %cst_5 : f32 to vector<192x128xf32>
    %7 = arith.maximumf %5, %6 : vector<192x128xf32>
    %c0_6 = arith.constant 0 : index
    %c0_7 = arith.constant 0 : index
    %8 = vector.load %arg4[%c0_6, %c0_7] : memref<192x128xf32, #tpu.memory_space<vmem>>, vector<192x128xf32>
    tpu.vector_store %arg4[%c0_6, %c0_7], %7 {strides = array<i32>} : memref<192x128xf32, #tpu.memory_space<vmem>>, vector<192x128xf32>,
    %c192_i32 = arith.constant 192 : i32
    %9 = arith.muli %arg0, %c192_i32 : i32
    %10 = tpu.iota {dimensions = array<i32: 0>} : vector<192x1xi32>
    %11 = vector.broadcast %9 : i32 to vector<192x1xi32>
    %12 = arith.addi %11, %10 : vector<192x1xi32>
    %c512_i32 = arith.constant 512 : i32
    %13 = vector.broadcast %c512_i32 : i32 to vector<192x1xi32>
    %14 = arith.cmpi slt, %12, %13 : vector<192x1xi32>
    %cst_8 = arith.constant 0.000000e+00 : f32
    %15 = vector.shape_cast %14 : vector<192x1xi1> to vector<192x1xi1>
    %16 = vector.broadcast %15 : vector<192x1xi1> to vector<192x128xi1>
    %17 = vector.broadcast %cst_8 : f32 to vector<192x128xf32>
    %18 = arith.select %16, %7, %17 : vector<192x128xi1>, vector<192x128xf32>
    %cst_9 = arith.constant dense<0.000000e+00> : vector<128xf32>
    %19 = vector.multi_reduction <add>, %18, %cst_9 [0] : vector<192x128xf32> to vector<128xf32>
    %20 = vector.shape_cast %19 : vector<128xf32> to vector<1x128xf32>
    %21 = vector.shape_cast %20 : vector<1x128xf32> to vector<1x128xf32>
    %22 = vector.broadcast %21 : vector<1x128xf32> to vector<8x128xf32>
    %c0_10 = arith.constant 0 : index
    %c0_11 = arith.constant 0 : index
    %23 = vector.load %arg5[%c0_10, %c0_11] : memref<8x128xf32, #tpu.memory_space<vmem>>, vector<8x128xf32>
    tpu.vector_store %arg5[%c0_10, %c0_11], %22 {strides = array<i32>} : memref<8x128xf32, #tpu.memory_space<vmem>>, vector<8x128xf32>,
    %24 = arith.mulf %18, %18 : vector<192x128xf32>
    %cst_12 = arith.constant dense<0.000000e+00> : vector<128xf32>
    %25 = vector.multi_reduction <add>, %24, %cst_12 [0] : vector<192x128xf32> to vector<128xf32>
    %26 = vector.shape_cast %25 : vector<128xf32> to vector<1x128xf32>
    %27 = vector.shape_cast %26 : vector<1x128xf32> to vector<1x128xf32>
    %28 = vector.broadcast %27 : vector<1x128xf32> to vector<8x128xf32>
    %c0_13 = arith.constant 0 : index
    %c0_14 = arith.constant 0 : index
    %29 = vector.load %arg6[%c0_13, %c0_14] : memref<8x128xf32, #tpu.memory_space<vmem>>, vector<8x128xf32>
    tpu.vector_store %arg6[%c0_13, %c0_14], %28 {strides = array<i32>} : memref<8x128xf32, #tpu.memory_space<vmem>>, vector<8x128xf32>,
    return
  }
  func.func @transform_0(%arg0: i32) -> (i32, i32) {
    %c0_i32 = arith.constant 0 : i32
    %c0_i32_0 = arith.constant 0 : i32
    return %arg0, %c0_i32 : i32, i32
  }
  func.func @transform_1(%arg0: i32) -> (i32, i32) {
    %c0_i32 = arith.constant 0 : i32
    %c0_i32_0 = arith.constant 0 : i32
    %c0_i32_1 = arith.constant 0 : i32
    return %c0_i32, %c0_i32_0 : i32, i32
  }
  func.func @transform_2(%arg0: i32) -> (i32, i32) {
    %c0_i32 = arith.constant 0 : i32
    %c0_i32_0 = arith.constant 0 : i32
    %c0_i32_1 = arith.constant 0 : i32
    return %c0_i32, %c0_i32_0 : i32, i32
  }
  func.func @transform_3(%arg0: i32) -> (i32, i32) {
    %c0_i32 = arith.constant 0 : i32
    %c0_i32_0 = arith.constant 0 : i32
    return %arg0, %c0_i32 : i32, i32
  }
  func.func @transform_4(%arg0: i32) -> (i32, i32) {
    %c0_i32 = arith.constant 0 : i32
    %c0_i32_0 = arith.constant 0 : i32
    return %arg0, %c0_i32 : i32, i32
  }
  func.func @transform_5(%arg0: i32) -> (i32, i32) {
    %c0_i32 = arith.constant 0 : i32
    %c0_i32_0 = arith.constant 0 : i32
    return %arg0, %c0_i32 : i32, i32
  }
}

module attributes {stable_mosaic.version = 11 : i64} {
  func.func @bn_affine_kernel(%arg0: i32, %arg1: memref<192x128xf32, #tpu.memory_space<vmem>>, %arg2: memref<1x128xf32, #tpu.memory_space<vmem>>, %arg3: memref<1x128xf32, #tpu.memory_space<vmem>>, %arg4: memref<192x128xf32, #tpu.memory_space<vmem>>) attributes {dimension_semantics = [#tpu.dimension_semantics<parallel>], iteration_bounds = array<i64: 3>, scalar_prefetch = 0 : i64, scratch_operands = 0 : i64, tpu.core_type = #tpu.core_type<tc>, window_params = [{transform_indices = @transform_0, window_bounds = array<i64: 192, 128>}, {pipeline_mode = #tpu.pipeline_mode<synchronous>, transform_indices = @transform_1, window_bounds = array<i64: 1, 128>}, {pipeline_mode = #tpu.pipeline_mode<synchronous>, transform_indices = @transform_2, window_bounds = array<i64: 1, 128>}, {transform_indices = @transform_3, window_bounds = array<i64: 192, 128>}]} {
    %c0 = arith.constant 0 : index
    %c0_0 = arith.constant 0 : index
    %0 = vector.load %arg1[%c0, %c0_0] : memref<192x128xf32, #tpu.memory_space<vmem>>, vector<192x128xf32>
    %c0_1 = arith.constant 0 : index
    %c0_2 = arith.constant 0 : index
    %1 = vector.load %arg2[%c0_1, %c0_2] : memref<1x128xf32, #tpu.memory_space<vmem>>, vector<1x128xf32>
    %2 = vector.broadcast %1 : vector<1x128xf32> to vector<192x128xf32>
    %3 = arith.mulf %0, %2 : vector<192x128xf32>
    %c0_3 = arith.constant 0 : index
    %c0_4 = arith.constant 0 : index
    %4 = vector.load %arg3[%c0_3, %c0_4] : memref<1x128xf32, #tpu.memory_space<vmem>>, vector<1x128xf32>
    %5 = vector.broadcast %4 : vector<1x128xf32> to vector<192x128xf32>
    %6 = arith.addf %3, %5 : vector<192x128xf32>
    %c0_5 = arith.constant 0 : index
    %c0_6 = arith.constant 0 : index
    %7 = vector.load %arg4[%c0_5, %c0_6] : memref<192x128xf32, #tpu.memory_space<vmem>>, vector<192x128xf32>
    tpu.vector_store %arg4[%c0_5, %c0_6], %6 {strides = array<i32>} : memref<192x128xf32, #tpu.memory_space<vmem>>, vector<192x128xf32>,
    return
  }
  func.func @transform_0(%arg0: i32) -> (i32, i32) {
    %c0_i32 = arith.constant 0 : i32
    %c0_i32_0 = arith.constant 0 : i32
    return %arg0, %c0_i32 : i32, i32
  }
  func.func @transform_1(%arg0: i32) -> (i32, i32) {
    %c0_i32 = arith.constant 0 : i32
    %c0_i32_0 = arith.constant 0 : i32
    %c0_i32_1 = arith.constant 0 : i32
    return %c0_i32, %c0_i32_0 : i32, i32
  }
  func.func @transform_2(%arg0: i32) -> (i32, i32) {
    %c0_i32 = arith.constant 0 : i32
    %c0_i32_0 = arith.constant 0 : i32
    %c0_i32_1 = arith.constant 0 : i32
    return %c0_i32, %c0_i32_0 : i32, i32
  }
  func.func @transform_3(%arg0: i32) -> (i32, i32) {
    %c0_i32 = arith.constant 0 : i32
    %c0_i32_0 = arith.constant 0 : i32
    return %arg0, %c0_i32 : i32, i32
  }
}

module attributes {stable_mosaic.version = 11 : i64} {
  func.func @conv_relu_stats_kernel(%arg0: i32, %arg1: memref<192x72xbf16, #tpu.memory_space<vmem>>, %arg2: memref<72x128xbf16, #tpu.memory_space<vmem>>, %arg3: memref<1x128xf32, #tpu.memory_space<vmem>>, %arg4: memref<192x128xf32, #tpu.memory_space<vmem>>, %arg5: memref<8x128xf32, #tpu.memory_space<vmem>>, %arg6: memref<8x128xf32, #tpu.memory_space<vmem>>) attributes {dimension_semantics = [#tpu.dimension_semantics<parallel>], iteration_bounds = array<i64: 3>, scalar_prefetch = 0 : i64, scratch_operands = 0 : i64, tpu.core_type = #tpu.core_type<tc>, window_params = [{transform_indices = @transform_0, window_bounds = array<i64: 192, 72>}, {pipeline_mode = #tpu.pipeline_mode<synchronous>, transform_indices = @transform_1, window_bounds = array<i64: 72, 128>}, {pipeline_mode = #tpu.pipeline_mode<synchronous>, transform_indices = @transform_2, window_bounds = array<i64: 1, 128>}, {transform_indices = @transform_3, window_bounds = array<i64: 192, 128>}, {transform_indices = @transform_4, window_bounds = array<i64: 8, 128>}, {transform_indices = @transform_5, window_bounds = array<i64: 8, 128>}]} {
    %c0 = arith.constant 0 : index
    %c0_0 = arith.constant 0 : index
    %0 = vector.load %arg1[%c0, %c0_0] : memref<192x72xbf16, #tpu.memory_space<vmem>>, vector<192x72xbf16>
    %c0_1 = arith.constant 0 : index
    %c0_2 = arith.constant 0 : index
    %1 = vector.load %arg2[%c0_1, %c0_2] : memref<72x128xbf16, #tpu.memory_space<vmem>>, vector<72x128xbf16>
    %cst = arith.constant dense<0.000000e+00> : vector<192x128xf32>
    %2 = tpu.matmul %0, %1, %cst {dimension_numbers = #tpu.dot_dimension_numbers<[1], [0], [0], [1], [0, 0, 1, 1], [], []>} : vector<192x72xbf16>, vector<72x128xbf16>, vector<192x128xf32> -> vector<192x128xf32>
    %c0_3 = arith.constant 0 : index
    %c0_4 = arith.constant 0 : index
    %3 = vector.load %arg3[%c0_3, %c0_4] : memref<1x128xf32, #tpu.memory_space<vmem>>, vector<1x128xf32>
    %4 = vector.broadcast %3 : vector<1x128xf32> to vector<192x128xf32>
    %5 = arith.addf %2, %4 : vector<192x128xf32>
    %cst_5 = arith.constant 0.000000e+00 : f32
    %6 = vector.broadcast %cst_5 : f32 to vector<192x128xf32>
    %7 = arith.maximumf %5, %6 : vector<192x128xf32>
    %c0_6 = arith.constant 0 : index
    %c0_7 = arith.constant 0 : index
    %8 = vector.load %arg4[%c0_6, %c0_7] : memref<192x128xf32, #tpu.memory_space<vmem>>, vector<192x128xf32>
    tpu.vector_store %arg4[%c0_6, %c0_7], %7 {strides = array<i32>} : memref<192x128xf32, #tpu.memory_space<vmem>>, vector<192x128xf32>,
    %c192_i32 = arith.constant 192 : i32
    %9 = arith.muli %arg0, %c192_i32 : i32
    %10 = tpu.iota {dimensions = array<i32: 0>} : vector<192x1xi32>
    %11 = vector.broadcast %9 : i32 to vector<192x1xi32>
    %12 = arith.addi %11, %10 : vector<192x1xi32>
    %c512_i32 = arith.constant 512 : i32
    %13 = vector.broadcast %c512_i32 : i32 to vector<192x1xi32>
    %14 = arith.cmpi slt, %12, %13 : vector<192x1xi32>
    %cst_8 = arith.constant 0.000000e+00 : f32
    %15 = vector.shape_cast %14 : vector<192x1xi1> to vector<192x1xi1>
    %16 = vector.broadcast %15 : vector<192x1xi1> to vector<192x128xi1>
    %17 = vector.broadcast %cst_8 : f32 to vector<192x128xf32>
    %18 = arith.select %16, %7, %17 : vector<192x128xi1>, vector<192x128xf32>
    %cst_9 = arith.constant dense<0.000000e+00> : vector<128xf32>
    %19 = vector.multi_reduction <add>, %18, %cst_9 [0] : vector<192x128xf32> to vector<128xf32>
    %20 = vector.shape_cast %19 : vector<128xf32> to vector<1x128xf32>
    %21 = vector.shape_cast %20 : vector<1x128xf32> to vector<1x128xf32>
    %22 = vector.broadcast %21 : vector<1x128xf32> to vector<8x128xf32>
    %c0_10 = arith.constant 0 : index
    %c0_11 = arith.constant 0 : index
    %23 = vector.load %arg5[%c0_10, %c0_11] : memref<8x128xf32, #tpu.memory_space<vmem>>, vector<8x128xf32>
    tpu.vector_store %arg5[%c0_10, %c0_11], %22 {strides = array<i32>} : memref<8x128xf32, #tpu.memory_space<vmem>>, vector<8x128xf32>,
    %24 = arith.mulf %18, %18 : vector<192x128xf32>
    %cst_12 = arith.constant dense<0.000000e+00> : vector<128xf32>
    %25 = vector.multi_reduction <add>, %24, %cst_12 [0] : vector<192x128xf32> to vector<128xf32>
    %26 = vector.shape_cast %25 : vector<128xf32> to vector<1x128xf32>
    %27 = vector.shape_cast %26 : vector<1x128xf32> to vector<1x128xf32>
    %28 = vector.broadcast %27 : vector<1x128xf32> to vector<8x128xf32>
    %c0_13 = arith.constant 0 : index
    %c0_14 = arith.constant 0 : index
    %29 = vector.load %arg6[%c0_13, %c0_14] : memref<8x128xf32, #tpu.memory_space<vmem>>, vector<8x128xf32>
    tpu.vector_store %arg6[%c0_13, %c0_14], %28 {strides = array<i32>} : memref<8x128xf32, #tpu.memory_space<vmem>>, vector<8x128xf32>,
    return
  }
  func.func @transform_0(%arg0: i32) -> (i32, i32) {
    %c0_i32 = arith.constant 0 : i32
    %c0_i32_0 = arith.constant 0 : i32
    return %arg0, %c0_i32 : i32, i32
  }
  func.func @transform_1(%arg0: i32) -> (i32, i32) {
    %c0_i32 = arith.constant 0 : i32
    %c0_i32_0 = arith.constant 0 : i32
    %c0_i32_1 = arith.constant 0 : i32
    return %c0_i32, %c0_i32_0 : i32, i32
  }
  func.func @transform_2(%arg0: i32) -> (i32, i32) {
    %c0_i32 = arith.constant 0 : i32
    %c0_i32_0 = arith.constant 0 : i32
    %c0_i32_1 = arith.constant 0 : i32
    return %c0_i32, %c0_i32_0 : i32, i32
  }
  func.func @transform_3(%arg0: i32) -> (i32, i32) {
    %c0_i32 = arith.constant 0 : i32
    %c0_i32_0 = arith.constant 0 : i32
    return %arg0, %c0_i32 : i32, i32
  }
  func.func @transform_4(%arg0: i32) -> (i32, i32) {
    %c0_i32 = arith.constant 0 : i32
    %c0_i32_0 = arith.constant 0 : i32
    return %arg0, %c0_i32 : i32, i32
  }
  func.func @transform_5(%arg0: i32) -> (i32, i32) {
    %c0_i32 = arith.constant 0 : i32
    %c0_i32_0 = arith.constant 0 : i32
    return %arg0, %c0_i32 : i32, i32
  }
}

</mosaic_0001>

<bundles_post_ra>
// kernel: convolution_block_forward.5
= control target key start
LH: loop header
LB: loop body
LE: loop exit
PB: predicated region body
PF: predicated region fallthrough
CT: control target
= control target key end

     0   :  { %8 = vsyncpa [#allocation3], 0  ;;  %s1249_s0 = inlined_call_operand.hbm [shape: f32[576,128], index: 0, kind: input, shape index: {}]   ;;  %s1250_s1 = inlined_call_operand.hbm [shape: f32[1,128], index: 1, kind: input, shape index: {}]   ;;  %s1251_s2 = inlined_call_operand.hbm [shape: f32[1,128], index: 2, kind: input, shape index: {}]   ;;  %s1252_s3 = inlined_call_operand.hbm [shape: bf16[576,128], index: 3, kind: output, shape index: {}]  }
   0x1   :  { %10 = vsyncpa [#allocation3 + $0x1], 0 }
   0x2   :  { %11 = vsyncpa [#allocation6], 0 }
   0x3   :  { %12 = vsyncpa [#allocation4], 0 }
   0x4   :  { %14 = vsyncpa [#allocation4 + $0x1], 0  ;;  %s923_s12 = smov 0   ;;  %s925_s13 = smov 0  }
   0x5   :  { %s927_s14 = smov 0   ;;  %s929_s15 = smov 0  }
   0x6 LB: > { %s944_s16 = sadd.s32 4294967295, %s893_s15   ;;  %s528_s17 = sadd.s32 4294967294, %s893_s15   ;;  %s893_s15 = sphi %s929_s15, %s1275_s15   ;;  %s889_s14 = sphi %s927_s14, %s1274_s14   ;;  %s885_s13 = sphi %s925_s13, %s1273_s13   ;;  %s881_s12 = sphi %s923_s12, %s1272_s12  }
   0x7   : > { %s948_s18 = sadd.s32 1, %s893_s15   ;;  %s27_s19 = sadd.s32 1, %s889_s14 }
   0x8   : > { %s24_s20 = ssub.s32 %s893_s15, %s948_s18  ;;  %p34_p0 = scmp.ne.s32.totalorder %s889_s14, %s885_s13 }
   0x9   : > { %p25_p1 = scmp.eq.s32.totalorder %s24_s20, 0  ;;  %p35_p2 = scmp.eq.s32.totalorder %s893_s15, 0 }
   0xa   : > { %p40_p3 = scmp.ne.s32.totalorder %s885_s13, %s881_s12  ;;  %p1253_p4 = scmp.eq.s32.totalorder %s944_s16, 0 }
   0xb   : > { %s960_s21 = scalar_select %p25_p1, %s889_s14, %s27_s19  }
   0xc   : > { %p962_p5 = por %p35_p2, %p34_p0  ;;  %p968_p6 = por %p1253_p4, %p40_p3 }
   0xd   : > { %p106_p7 = scmp.eq.s32.totalorder %s944_s16, 2  ;;  %p112_p8 = scmp.eq.s32.totalorder %s528_s17, 2 }
   0xe   : > { %s1259_s23 = scalar_select %p968_p6, 1, 0 }
   0xf   : > { %p529_p9 = scmp.ge.s32.totalorder %s893_s15, 1  ;;  %p119_p10 = scmp.lt.s32.totalorder %s893_s15, 4 }
  0x10   : > { %p975_p11 = por %p106_p7, %p34_p0  ;;  %p979_p12 = por %p112_p8, %p40_p3 }
  0x11   : > { %p983_p13 = pnand %p529_p9, %p119_p10  ;;  %s895_s27 = smov [#allocation5]  }
  0x12   : > { %s1260_s24 = scalar_select %p975_p11, 1, 0 }
  0x13   : > { %s1261_s25 = scalar_select %p979_p12, 1, 0 }
  0x14   : > { %s1262_s26 = scalar_select %p983_p13, 1, 0 }
  0x15   : > { %p678_p1 = pneg %p983_p13  ;;  %s132_s28 = sshll.u32 %s895_s27, 4  ;;  %s133_s28 = int_to_ptr.vmem [resolvable:$true] %s132_s28 }
  0x16   : > { %p695_p2 = scmp.lt.s32.totalorder %s893_s15, 3  ;;  %s896_s4 = smov [#allocation7]  }
  0x17   : > { %p992_p0 = pnand %p678_p1, %p1253_p4  ;;  %s143_s5 = sshll.u32 %s896_s4, 4  ;;  %s1002_s5 = int_to_ptr.vmem [resolvable:$true] %s143_s5 }
  0x18   : > { %p998_p3 = pnand %p695_p2, %p962_p5  ;;  %s737_s8 = scalar_lea.hbm %s1250_s1, 16 }
  0x19   : > { %p738_p7 = scmp.ne.s32.totalorder %s1250_s1, %s737_s8  ;;  %p739_p8 = pneg %p992_p0 }
  0x1a   : > { %s1264_s30 = scalar_select %p998_p3, 1, 0 }
  0x1b   : > { %p740_p5 = pnand %p739_p8, %p738_p7  ;;  %p744_p10 = scmp.lt.u32.totalorder %s737_s8, %s1250_s1 }
  0x1d   : > { %p741_p9 = pneg %p740_p5 }
  0x1f   : > { %p746_p1 = pnand %p744_p10, %p741_p9 }
  0x21   : > { %749 = shalt.err (!%p746_p1)
}
  0x22   : > { %s750_s19 = scalar_lea.vmem %s133_s28, 16  ;;  %s757_s20 = scalar_lea.vmem %s133_s28, 32 }
  0x23   : > { %p751_p2 = scmp.ne.s32.totalorder %s133_s28, %s750_s19  ;;  %p758_p11 = scmp.lt.s32.totalorder %s133_s28, %s133_s28 }
  0x24   : > { %p759_p6 = scmp.lt.s32.totalorder %s757_s20, %s750_s19 }
  0x25   : > { %p753_p4 = pnand %p751_p2, %p739_p8 }
  0x26   : > { %p760_p13 = por %p759_p6, %p758_p11 }
  0x27   : > { %p754_p12 = pneg %p753_p4 }
  0x29   : > { %p761_p3 = pnand %p760_p13, %p754_p12 }
  0x2b   : > { %764 = shalt.err (!%p761_p3)
}
  0x2c   : > { %681 = dma.hbm_to_vmem [thread:$0]  (!%p992_p0), %s1250_s1, 16, %s133_s28, [#allocation6]  }
  0x2d   : > { %s154_s4 = sand.u32 1, %s889_s14   ;;  %s765_s8 = scalar_lea.hbm %s1251_s2, 16 }
  0x2e   : > { %p766_p4 = scmp.ne.s32.totalorder %s1251_s2, %s765_s8  ;;  %p772_p12 = scmp.lt.u32.totalorder %s765_s8, %s1251_s2 }
  0x30   : > { %p768_p6 = pnand %p766_p4, %p739_p8 }
  0x32   : > { %p769_p11 = pneg %p768_p6 }
  0x34   : > { %p774_p13 = pnand %p772_p12, %p769_p11 }
  0x36   : > { %777 = shalt.err (!%p774_p13)
}
  0x37   : > { %s778_s28 = scalar_lea.vmem %s1002_s5, 16  ;;  %s785_s19 = scalar_lea.vmem %s1002_s5, 32 }
  0x38   : > { %p779_p3 = scmp.ne.s32.totalorder %s1002_s5, %s778_s28  ;;  %p786_p9 = scmp.lt.s32.totalorder %s1002_s5, %s1002_s5 }
  0x39   : > { %p787_p10 = scmp.lt.s32.totalorder %s785_s19, %s778_s28 }
  0x3a   : > { %p781_p7 = pnand %p779_p3, %p739_p8 }
  0x3b   : > { %p788_p1 = por %p787_p10, %p786_p9 }
  0x3c   : > { %p782_p5 = pneg %p781_p7 }
  0x3e   : > { %p789_p2 = pnand %p788_p1, %p782_p5 }
  0x40   : > { %792 = shalt.err (!%p789_p2)
}
  0x41   : > { %684 = dma.hbm_to_vmem [thread:$0]  (!%p992_p0), %s1251_s2, 16, %s1002_s5, [#allocation6]  }
  0x42   : > { %s663_s27 = smul.u32 192, %s154_s4  ;;  %s1061_s11 = scalar_lea.sflag [#allocation3], %s154_s4 }
  0x43   : > { %s566_s6 = smul.u32 3072, %s893_s15  ;;  %p1265_p0 = scmp.ne.s32.totalorder %s1264_s30, 0 }
  0x44   : > { %s158_s29 = scalar_lea.vmem [#allocation2], %s663_s27  ;;  %s798_s19 = scalar_lea.hbm %s1249_s0, 9216 }
  0x45   : > { %s1057_s9 = scalar_lea.hbm %s1249_s0, %s566_s6  ;;  %s165_s10 = sshll.u32 %s158_s29, 4  ;;  %s1059_s10 = int_to_ptr.vmem [resolvable:$true] %s165_s10 }
  0x46   : > { %s793_s17 = scalar_lea.hbm %s1057_s9, 3072  ;;  %p795_p4 = pneg %p1265_p0 }
  0x47   : > { %p794_p8 = scmp.ne.s32.totalorder %s1057_s9, %s793_s17  ;;  %p799_p12 = scmp.lt.u32.totalorder %s1057_s9, %s1249_s0 }
  0x48   : > { %p800_p13 = scmp.lt.u32.totalorder %s798_s19, %s793_s17  ;;  %p802_p7 = scmp.lt.u32.totalorder %s793_s17, %s1057_s9 }
  0x49   : > { %p796_p6 = pnand %p795_p4, %p794_p8 }
  0x4a   : > { %p801_p3 = por %p800_p13, %p799_p12 }
  0x4b   : > { %p797_p11 = pneg %p796_p6 }
  0x4c   : > { %p803_p5 = por %p802_p7, %p801_p3 }
  0x4e   : > { %p804_p9 = pnand %p803_p5, %p797_p11 }
  0x50   : > { %807 = shalt.err (!%p804_p9)
}
  0x51   : > { %s808_s4 = scalar_lea.vmem %s1059_s10, 3072  ;;  %s897_s27 = smov [#allocation2]  }
  0x52   : > { %p809_p10 = scmp.ne.s32.totalorder %s1059_s10, %s808_s4  ;;  %s813_s6 = sshll.u32 %s897_s27, 4  ;;  %s814_s6 = int_to_ptr.vmem [resolvable:$false] %s813_s6 }
  0x53   : > { %s815_s7 = scalar_lea.vmem %s814_s6, 6144  ;;  %p816_p8 = scmp.lt.s32.totalorder %s1059_s10, %s814_s6 }
  0x54   : > { %p811_p1 = pnand %p809_p10, %p795_p4  ;;  %p817_p6 = scmp.lt.s32.totalorder %s815_s7, %s808_s4 }
  0x56   : > { %p812_p2 = pneg %p811_p1  ;;  %p818_p12 = por %p817_p6, %p816_p8 }
  0x58   : > { %p819_p13 = pnand %p818_p12, %p812_p2 }
  0x5a   : > { %822 = shalt.err (!%p819_p13)
}
  0x5b   : > { %s898_s8 = smov 128   ;;  %s899_s29 = smov 8  }
  0x5c   : > { %688 = dma.hbm_to_vmem [thread:$0]  (!%p1265_p0), %s1057_s9, 3072, %s1059_s10, %s1061_s11, %s898_s8, %s898_s8, %s899_s29  }
  0x5d   : > { %p1266_p4 = scmp.ne.s32.totalorder %s1262_s26, 0 }
  0x5e   : > { %s1092_s17 = sand.u32 (!%p1266_p4), 1, %s885_s13   ;;  %p1267_p11 = scmp.ne.s32.totalorder (!%p1266_p4), %s1259_s23, 0 }
  0x5f   : > { %177 = sbr.rel (%p1266_p4) target bundleno = 142 (0x8e), region = 32  ;;  %s180_s28 = scalar_lea.sflag (!%p1266_p4), [#allocation3], %s1092_s17 }
  0x60   : > { %s664_s5 = smul.u32 (!%p1266_p4), 192, %s1092_s17 }
  0x62   : > { %s1096_s19 = scalar_lea.vmem (!%p1266_p4), [#allocation2], %s664_s5 }
  0x66   : > { %868 = dma.done.wait (%p1267_p11), %s180_s28, 3072  }
  0x67   : > { %870 = vsyncadd (%p1267_p11), %s180_s28, 4294964224  ;;  %p1268_p0 = scmp.eq.s32.totalorder %s944_s16, 0 }
  0x69   : > { %872 = dma.done.wait (%p1268_p0), [#allocation6], 32   ;;  %p1269_p3 = pmov %p1268_p0 }
  0x6a   : > { %s665_s26 = smul.u32 96, %s1092_s17  ;;  %v216_v0 = vld [vmem:[%s1096_s19] sm:$0xff]  ;;  %v217_v1 = vld [vmem:[%s1096_s19 + $0x8] sm:$0xff]  ;;  %v218_v6 = vld [vmem:[%s1096_s19 + $0x10] sm:$0xff]  ;;  %s423_s20 = scalar_lea.sflag [#allocation4], %s1092_s17 }
  0x6b   : > { %874 = vsyncadd (%p1269_p3), [#allocation6], 4294967264  ;;  %v1109_v2 = vld [vmem:[#allocation5] ss:$0 sm:$0xff]  ;;  %v1113_v5 = vld [vmem:[#allocation7] ss:$0 sm:$0xff] }
  0x6c   : > { %v247_v3 = vmul.f32 %v1109_v2, %v216_v0  ;;  %v248_v4 = vmul.f32 %v1109_v2, %v217_v1  ;;  %v219_v7 = vld [vmem:[%s1096_s19 + $0x18] sm:$0xff]  ;;  %v249_v8 = vmul.f32 %v1109_v2, %v218_v6  ;;  %v220_v10 = vld [vmem:[%s1096_s19 + $0x20] sm:$0xff]  ;;  %v221_v11 = vld [vmem:[%s1096_s19 + $0x28] sm:$0xff]  ;;  %s1147_s23 = scalar_lea.vmem [#allocation8], %s665_s26  ;;  %s591_s30 = smul.u32 1536, %s944_s16 }
  0x6d   : > { %v250_v9 = vmul.f32 %v1109_v2, %v219_v7  ;;  %v222_v12 = vld [vmem:[%s1096_s19 + $0x30] sm:$0xff]  ;;  %v251_v15 = vmul.f32 %v1109_v2, %v220_v10  ;;  %v252_v16 = vmul.f32 %v1109_v2, %v221_v11  ;;  %v223_v17 = vld [vmem:[%s1096_s19 + $0x38] sm:$0xff]  ;;  %v224_v18 = vld [vmem:[%s1096_s19 + $0x40] sm:$0xff]  ;;  %s436_s9 = sshll.u32 %s1147_s23, 4  ;;  %p1270_p5 = scmp.ne.s32.totalorder %s1260_s24, 0  ;;  %s1204_s9 = int_to_ptr.vmem [resolvable:$true] %s436_s9 }
  0x6e   : > { %v278_v13 = vadd.f32 %v1113_v5, %v247_v3  ;;  %v279_v14 = vadd.f32 %v1113_v5, %v248_v4  ;;  %v225_v19 = vld [vmem:[%s1096_s19 + $0x48] sm:$0xff]  ;;  %v280_v20 = vadd.f32 %v1113_v5, %v249_v8  ;;  %v253_v22 = vmul.f32 %v1109_v2, %v222_v12  ;;  %v226_v24 = vld [vmem:[%s1096_s19 + $0x50] sm:$0xff]  ;;  %v227_v25 = vld [vmem:[%s1096_s19 + $0x58] sm:$0xff]  ;;  %s1202_s11 = scalar_lea.hbm %s1252_s3, %s591_s30  ;;  %s823_s22 = scalar_lea.vmem %s1204_s9, 1536 }
  0x6f   : > { %v281_v21 = vadd.f32 %v1113_v5, %v250_v9  ;;  %v254_v23 = vmul.f32 %v1109_v2, %v223_v17  ;;  %v282_v27 = vadd.f32 %v1113_v5, %v251_v15  ;;  %v283_v28 = vadd.f32 %v1113_v5, %v252_v16  ;;  %v228_v30 = vld [vmem:[%s1096_s19 + $0x60] sm:$0xff]  ;;  %v229_v31 = vld [vmem:[%s1096_s19 + $0x68] sm:$0xff]  ;;  %v230_v36 = vld [vmem:[%s1096_s19 + $0x70] sm:$0xff]  ;;  %p824_p7 = scmp.ne.s32.totalorder %s1204_s9, %s823_s22  ;;  %s900_s4 = smov [#allocation8]  }
  0x70   : > { %v595_v26 = vpack.c.bf16 %v279_v14, %v278_v13  ;;  %v255_v29 = vmul.f32 %v1109_v2, %v224_v18  ;;  %v284_v33 = vadd.f32 %v1113_v5, %v253_v22  ;;  %v256_v35 = vmul.f32 %v1109_v2, %v225_v19  ;;  %v231_v37 = vld [vmem:[%s1096_s19 + $0x78] sm:$0xff]  ;;  %v232_v42 = vld [vmem:[%s1096_s19 + $0x80] sm:$0xff]  ;;  %v233_v47 = vld [vmem:[%s1096_s19 + $0x88] sm:$0xff]  ;;  %s827_s27 = sshll.u32 %s900_s4, 4  ;;  %s828_s27 = int_to_ptr.vmem [resolvable:$false] %s827_s27 }
  0x71   : > { %v600_v32 = vpack.c.bf16 %v281_v21, %v280_v20  ;;  %v285_v34 = vadd.f32 %v1113_v5, %v254_v23  ;;  %v605_v38 = vpack.c.bf16 %v283_v28, %v282_v27  ;;  %v257_v40 = vmul.f32 %v1109_v2, %v226_v24  ;;  %v234_v52 = vld [vmem:[%s1096_s19 + $0x90] sm:$0xff]  ;;  %v235_v53 = vld [vmem:[%s1096_s19 + $0x98] sm:$0xff]  ;;  %v236_v58 = vld [vmem:[%s1096_s19 + $0xa0] sm:$0xff]  ;;  %p825_p9 = pnand %p824_p7, %p1270_p5  ;;  %s829_s6 = scalar_lea.vmem %s828_s27, 3072 }
  0x72   : > { %596 = vst [vmem:[%s1147_s23] sm:$0xff] %v595_v26   ;;  %v286_v39 = vadd.f32 %v1113_v5, %v255_v29  ;;  %v258_v41 = vmul.f32 %v1109_v2, %v227_v25  ;;  %v287_v44 = vadd.f32 %v1113_v5, %v256_v35  ;;  %v259_v45 = vmul.f32 %v1109_v2, %v228_v30  ;;  %v237_v59 = vld [vmem:[%s1096_s19 + $0xa8] sm:$0xff]  ;;  %v238_v0 = vld [vmem:[%s1096_s19 + $0xb0] sm:$0xff]  ;;  %v239_v1 = vld [vmem:[%s1096_s19 + $0xb8] sm:$0xff]  ;;  %p830_p1 = scmp.lt.s32.totalorder %s1204_s9, %s828_s27  ;;  %p831_p2 = scmp.lt.s32.totalorder %s829_s6, %s823_s22 }
  0x73   : > { %652 = vst [vmem:[%s1147_s23 + $0x8] sm:$0xff] %v600_v32   ;;  %v610_v43 = vpack.c.bf16 %v285_v34, %v284_v33  ;;  %v260_v46 = vmul.f32 %v1109_v2, %v229_v31  ;;  %653 = vst [vmem:[%s1147_s23 + $0x10] sm:$0xff] %v605_v38   ;;  %v288_v48 = vadd.f32 %v1113_v5, %v257_v40  ;;  %p826_p10 = pneg %p825_p9 }
  0x74   : > { %v289_v49 = vadd.f32 %v1113_v5, %v258_v41  ;;  %v261_v50 = vmul.f32 %v1109_v2, %v230_v36  ;;  %v262_v51 = vmul.f32 %v1109_v2, %v231_v37  ;;  %v615_v54 = vpack.c.bf16 %v287_v44, %v286_v39  ;;  %p832_p8 = por %p831_p2, %p830_p1 }
  0x75   : > { %654 = vst [vmem:[%s1147_s23 + $0x18] sm:$0xff] %v610_v43   ;;  %v290_v55 = vadd.f32 %v1113_v5, %v259_v45  ;;  %v291_v56 = vadd.f32 %v1113_v5, %v260_v46  ;;  %v263_v57 = vmul.f32 %v1109_v2, %v232_v42  ;;  %v264_v63 = vmul.f32 %v1109_v2, %v233_v47 }
  0x76   : > { %v620_v60 = vpack.c.bf16 %v289_v49, %v288_v48  ;;  %v292_v61 = vadd.f32 %v1113_v5, %v261_v50  ;;  %v293_v62 = vadd.f32 %v1113_v5, %v262_v51  ;;  %655 = vst [vmem:[%s1147_s23 + $0x20] sm:$0xff] %v615_v54   ;;  %v265_v6 = vmul.f32 %v1109_v2, %v234_v52  ;;  %p833_p6 = pnand %p832_p8, %p826_p10 }
  0x77   : > { %v625_v3 = vpack.c.bf16 %v291_v56, %v290_v55  ;;  %v294_v4 = vadd.f32 %v1113_v5, %v263_v57  ;;  %v266_v7 = vmul.f32 %v1109_v2, %v235_v53  ;;  %v295_v9 = vadd.f32 %v1113_v5, %v264_v63 }
  0x78   : > { %656 = vst [vmem:[%s1147_s23 + $0x28] sm:$0xff] %v620_v60   ;;  %v630_v8 = vpack.c.bf16 %v293_v62, %v292_v61  ;;  %v267_v10 = vmul.f32 %v1109_v2, %v236_v58  ;;  %v268_v11 = vmul.f32 %v1109_v2, %v237_v59  ;;  %v296_v12 = vadd.f32 %v1113_v5, %v265_v6 }
  0x79   : > { %657 = vst [vmem:[%s1147_s23 + $0x30] sm:$0xff] %v625_v3   ;;  %v297_v13 = vadd.f32 %v1113_v5, %v266_v7  ;;  %v269_v14 = vmul.f32 %v1109_v2, %v238_v0  ;;  %v270_v15 = vmul.f32 %v1109_v2, %v239_v1  ;;  %v635_v16 = vpack.c.bf16 %v295_v9, %v294_v4 }
  0x7a   : > { %658 = vst [vmem:[%s1147_s23 + $0x38] sm:$0xff] %v630_v8   ;;  %v298_v17 = vadd.f32 %v1113_v5, %v267_v10  ;;  %v299_v18 = vadd.f32 %v1113_v5, %v268_v11 }
  0x7b   : > { %v640_v19 = vpack.c.bf16 %v297_v13, %v296_v12  ;;  %v300_v20 = vadd.f32 %v1113_v5, %v269_v14  ;;  %v301_v21 = vadd.f32 %v1113_v5, %v270_v15  ;;  %659 = vst [vmem:[%s1147_s23 + $0x40] sm:$0xff] %v635_v16  }
  0x7c   : > { %v645_v22 = vpack.c.bf16 %v299_v18, %v298_v17 }
  0x7d   : > { %660 = vst [vmem:[%s1147_s23 + $0x48] sm:$0xff] %v640_v19   ;;  %v650_v2 = vpack.c.bf16 %v301_v21, %v300_v20 }
  0x7e   : > { %661 = vst [vmem:[%s1147_s23 + $0x50] sm:$0xff] %v645_v22  }
  0x7f   : > { %662 = vst [vmem:[%s1147_s23 + $0x58] sm:$0xff] %v650_v2  }
  0x80   : > { %836 = shalt.err (!%p833_p6)
}
  0x81   : > { %s837_s7 = scalar_lea.hbm %s1202_s11, 1536  ;;  %s841_s5 = scalar_lea.hbm %s1252_s3, 4608 }
  0x82   : > { %p838_p12 = scmp.ne.s32.totalorder %s1202_s11, %s837_s7  ;;  %p842_p11 = scmp.lt.u32.totalorder %s1202_s11, %s1252_s3 }
  0x83   : > { %p843_p0 = scmp.lt.u32.totalorder %s841_s5, %s837_s7  ;;  %p845_p7 = scmp.lt.u32.totalorder %s837_s7, %s1202_s11 }
  0x84   : > { %p839_p13 = pnand %p838_p12, %p1270_p5 }
  0x85   : > { %p844_p3 = por %p843_p0, %p842_p11 }
  0x86   : > { %p840_p4 = pneg %p839_p13 }
  0x87   : > { %p846_p9 = por %p845_p7, %p844_p3 }
  0x89   : > { %p847_p10 = pnand %p846_p9, %p840_p4 }
  0x8b   : > { %850 = shalt.err (!%p847_p10)
}
  0x8c   : > { %s901_s26 = smov 64   ;;  %s902_s23 = smov 4  }
  0x8d   : > { %676 = dma.vmem_to_hbm [thread:$0]  (%p1270_p5), %s1204_s9, 1536, %s1202_s11, %s423_s20, %s901_s26, %s901_s26, %s902_s23  }
  0x8e PF: > { %p698_p1 = scmp.ge.s32.totalorder %s893_s15, 2  ;;  %s451_s30 = sand.u32 1, %s881_s12  }
  0x8f   : > { %p1271_p2 = scmp.ne.s32.totalorder %s1261_s25, 0  ;;  %s452_s16 = scalar_lea.sflag [#allocation4], %s451_s30 }
  0x91   : > { %p690_p8 = pnand %p698_p1, %p1271_p2 }
  0x93   : > { %876 = dma.done.wait (!%p690_p8), %s452_s16, 1536  }
  0x94   : > { %878 = vsyncadd (!%p690_p8), %s452_s16, 4294965760  ;;  %p17_p6 = scmp.ge.s32.totalorder %s948_s18, 5   ;;  %s1272_s12 = smov %s885_s13 }
  0x95   : > { %s1273_s13 = smov %s889_s14  ;;  %s1274_s14 = smov %s960_s21 }
  0x96   : > { %s1275_s15 = smov %s948_s18  ;;  %19 = sbr.rel (!%p17_p6) target bundleno = 6 (0x6), region = 85 }
  0x9d   :  { %457 = vsyncpa [#allocation3], 1 }
  0x9e   :  { %459 = vsyncpa [#allocation3 + $0x1], 1 }
  0x9f   :  { %460 = vsyncpa [#allocation6], 1 }
  0xa0   :  { %461 = vsyncpa [#allocation4], 1 }
  0xa1   :  { %463 = vsyncpa [#allocation4 + $0x1], 1 }

// kernel: convolution_block_forward.4
= control target key start
LH: loop header
LB: loop body
LE: loop exit
PB: predicated region body
PF: predicated region fallthrough
CT: control target
= control target key end

     0   :  { %11 = vsyncpa [#allocation3], 0  ;;  %s2117_s0 = inlined_call_operand.hbm [shape: bf16[576,36], index: 0, kind: input, shape index: {}]   ;;  %s2118_s1 = inlined_call_operand.hbm [shape: bf16[36,128], index: 1, kind: input, shape index: {}]   ;;  %s2119_s2 = inlined_call_operand.hbm [shape: f32[1,128], index: 2, kind: input, shape index: {}]   ;;  %s2120_s3 = inlined_call_operand.hbm [shape: f32[576,128], index: 3, kind: output, shape index: {0}]   ;;  %s2121_s4 = inlined_call_operand.hbm [shape: f32[24,128], index: 4, kind: output, shape index: {1}]   ;;  %s2122_s5 = inlined_call_operand.hbm [shape: f32[24,128], index: 5, kind: output, shape index: {2}]  }
   0x1   :  { %13 = vsyncpa [#allocation3 + $0x1], 0 }
   0x2   :  { %14 = vsyncpa [#allocation6], 0 }
   0x3   :  { %15 = vsyncpa [#allocation4], 0 }
   0x4   :  { %17 = vsyncpa [#allocation4 + $0x1], 0 }
   0x5   :  { %18 = vsyncpa [#allocation10], 0 }
   0x6   :  { %20 = vsyncpa [#allocation10 + $0x1], 0  ;;  %s1512_s18 = smov 0   ;;  %s1514_s19 = smov 0  }
   0x7   :  { %s1516_s20 = smov 0   ;;  %s1518_s21 = smov 0  }
   0x8 LB: > { %s1533_s22 = sadd.s32 4294967295, %s1470_s21   ;;  %s2126_s23 = sadd.s32 4294967294, %s1470_s21   ;;  %s1470_s21 = sphi %s1518_s21, %s2145_s21   ;;  %s1466_s20 = sphi %s1516_s20, %s2144_s20   ;;  %s1462_s19 = sphi %s1514_s19, %s2143_s19   ;;  %s1458_s18 = sphi %s1512_s18, %s2142_s18  }
   0x9   : > { %p46_p0 = scmp.ne.s32.totalorder %s1462_s19, %s1458_s18  ;;  %p2123_p1 = scmp.eq.s32.totalorder %s1533_s22, 0 }
   0xa   : > { %p118_p3 = scmp.eq.s32.totalorder %s2126_s23, 2  ;;  %p1055_p5 = scmp.ge.s32.totalorder %s1470_s21, 1 }
   0xb   : > { %p1544_p4 = por %p2123_p1, %p46_p0  ;;  %p177_p7 = scmp.lt.s32.totalorder %s1470_s21, 4 }
   0xc   : > { %p1549_p6 = por %p118_p3, %p46_p0  ;;  %s1472_s27 = smov [#allocation5]  }
   0xd   : > { %s2128_s24 = scalar_select %p1544_p4, 1, 0 }
   0xe   : > { %s2129_s25 = scalar_select %p1549_p6, 1, 0 }
   0xf   : > { %p1554_p8 = pnand %p1055_p5, %p177_p7  ;;  %s189_s28 = sshll.u32 %s1472_s27, 4  ;;  %s190_s28 = int_to_ptr.vmem [resolvable:$true] %s189_s28 }
  0x10   : > { %s1473_s30 = smov [#allocation7]   ;;  %s1254_s9 = scalar_lea.hbm %s2118_s1, 320 }
  0x11   : > { %s2130_s26 = scalar_select %p1554_p8, 1, 0 }
  0x12   : > { %p1174_p9 = pneg %p1554_p8  ;;  %s203_s6 = sshll.u32 %s1473_s30, 4  ;;  %s1566_s6 = int_to_ptr.vmem [resolvable:$true] %s203_s6 }
  0x13   : > { %p1255_p11 = scmp.ne.s32.totalorder %s2118_s1, %s1254_s9  ;;  %p1261_p3 = scmp.lt.u32.totalorder %s1254_s9, %s2118_s1 }
  0x14   : > { %p1562_p10 = pnand %p1174_p9, %p2123_p1 }
  0x16   : > { %p1256_p12 = pneg %p1562_p10 }
  0x18   : > { %p1257_p13 = pnand %p1256_p12, %p1255_p11 }
  0x1a   : > { %p1258_p0 = pneg %p1257_p13 }
  0x1c   : > { %p1263_p5 = pnand %p1261_p3, %p1258_p0 }
  0x1e   : > { %1266 = shalt.err (!%p1263_p5)
}
  0x1f   : > { %s1267_s14 = scalar_lea.vmem %s190_s28, 320  ;;  %p1275_p2 = scmp.lt.s32.totalorder %s190_s28, %s190_s28 }
  0x20   : > { %p1268_p7 = scmp.ne.s32.totalorder %s190_s28, %s1267_s14  ;;  %p1276_p6 = scmp.lt.s32.totalorder %s1267_s14, %s1267_s14 }
  0x22   : > { %p1270_p9 = pnand %p1268_p7, %p1256_p12  ;;  %p1277_p4 = por %p1276_p6, %p1275_p2 }
  0x24   : > { %p1271_p1 = pneg %p1270_p9 }
  0x26   : > { %p1278_p8 = pnand %p1277_p4, %p1271_p1 }
  0x28   : > { %1281 = shalt.err (!%p1278_p8)
}
  0x29   : > { %s2127_s15 = smov 64   ;;  %s1475_s16 = smov 4  }
  0x2a   : > { %1177 = dma.hbm_to_vmem [thread:$0]  (!%p1562_p10), %s2118_s1, 320, %s190_s28, [#allocation6], %s2127_s15, %s2127_s15, %s1475_s16  }
  0x2b   : > { %s1282_s8 = scalar_lea.hbm %s2119_s2, 16 }
  0x2c   : > { %p1283_p1 = scmp.ne.s32.totalorder %s2119_s2, %s1282_s8  ;;  %p1289_p6 = scmp.lt.u32.totalorder %s1282_s8, %s2119_s2 }
  0x2e   : > { %p1285_p2 = pnand %p1283_p1, %p1256_p12 }
  0x30   : > { %p1286_p4 = pneg %p1285_p2 }
  0x32   : > { %p1291_p8 = pnand %p1289_p6, %p1286_p4 }
  0x34   : > { %1294 = shalt.err (!%p1291_p8)
}
  0x35   : > { %s1295_s28 = scalar_lea.vmem %s1566_s6, 16  ;;  %s1302_s13 = scalar_lea.vmem %s1566_s6, 32 }
  0x36   : > { %p1296_p11 = scmp.ne.s32.totalorder %s1566_s6, %s1295_s28  ;;  %p1303_p3 = scmp.lt.s32.totalorder %s1566_s6, %s1566_s6 }
  0x37   : > { %p1304_p5 = scmp.lt.s32.totalorder %s1302_s13, %s1295_s28 }
  0x38   : > { %p1298_p13 = pnand %p1296_p11, %p1256_p12 }
  0x39   : > { %p1305_p7 = por %p1304_p5, %p1303_p3 }
  0x3a   : > { %p1299_p0 = pneg %p1298_p13 }
  0x3c   : > { %p1306_p9 = pnand %p1305_p7, %p1299_p0 }
  0x3e   : > { %1309 = shalt.err (!%p1306_p9)
}
  0x3f   : > { %1180 = dma.hbm_to_vmem [thread:$0]  (!%p1562_p10), %s2119_s2, 16, %s1566_s6, [#allocation6]  }
  0x40   : > { %s1620_s27 = sadd.s32 1, %s1470_s21   ;;  %s33_s29 = sadd.s32 1, %s1466_s20 }
  0x41   : > { %s30_s30 = ssub.s32 %s1470_s21, %s1620_s27  ;;  %p40_p12 = scmp.ne.s32.totalorder %s1466_s20, %s1462_s19 }
  0x42   : > { %p31_p1 = scmp.eq.s32.totalorder %s30_s30, 0  ;;  %p41_p2 = scmp.eq.s32.totalorder %s1470_s21, 0 }
  0x43   : > { %p2132_p4 = scmp.eq.s32.totalorder %s1533_s22, 2  ;;  %p1197_p8 = scmp.lt.s32.totalorder %s1470_s21, 3 }
  0x44   : > { %s1636_s8 = scalar_select %p31_p1, %s1466_s20, %s33_s29  }
  0x45   : > { %p1630_p6 = por %p2132_p4, %p40_p12  ;;  %p42_p11 = por %p41_p2, %p40_p12 }
  0x46   : > { %s214_s9 = sand.u32 1, %s1466_s20   ;;  %s1100_s6 = smul.u32 1536, %s1470_s21 }
  0x47   : > { %s1155_s10 = smul.u32 96, %s214_s9  ;;  %p1640_p10 = pnand %p1197_p8, %p42_p11 }
  0x48   : > { %s1647_s13 = scalar_lea.hbm %s2117_s0, %s1100_s6  ;;  %s1651_s29 = scalar_lea.sflag [#allocation3], %s214_s9 }
  0x49   : > { %s218_s14 = scalar_lea.vmem [#allocation2], %s1155_s10  ;;  %s1310_s30 = scalar_lea.hbm %s1647_s13, 1536 }
  0x4a   : > { %s225_s17 = sshll.u32 %s218_s14, 4  ;;  %p1311_p13 = scmp.ne.s32.totalorder %s1647_s13, %s1310_s30  ;;  %s1649_s17 = int_to_ptr.vmem [resolvable:$true] %s225_s17 }
  0x4b   : > { %p1312_p0 = pneg %p1640_p10  ;;  %s1315_s28 = scalar_lea.hbm %s2117_s0, 4608 }
  0x4c   : > { %p1316_p7 = scmp.lt.u32.totalorder %s1647_s13, %s2117_s0  ;;  %p1317_p9 = scmp.lt.u32.totalorder %s1315_s28, %s1310_s30 }
  0x4d   : > { %p1313_p3 = pnand %p1312_p0, %p1311_p13  ;;  %p1319_p1 = scmp.lt.u32.totalorder %s1310_s30, %s1647_s13 }
  0x4e   : > { %p1318_p12 = por %p1317_p9, %p1316_p7 }
  0x4f   : > { %p1314_p5 = pneg %p1313_p3 }
  0x50   : > { %p1320_p2 = por %p1319_p1, %p1318_p12 }
  0x52   : > { %p1321_p4 = pnand %p1320_p2, %p1314_p5 }
  0x54   : > { %1324 = shalt.err (!%p1321_p4)
}
  0x55   : > { %s1325_s9 = scalar_lea.vmem %s1649_s17, 1536  ;;  %s1476_s10 = smov [#allocation2]  }
  0x56   : > { %p1326_p8 = scmp.ne.s32.totalorder %s1649_s17, %s1325_s9  ;;  %s1330_s14 = sshll.u32 %s1476_s10, 4  ;;  %s1331_s14 = int_to_ptr.vmem [resolvable:$false] %s1330_s14 }
  0x57   : > { %s1332_s23 = scalar_lea.vmem %s1331_s14, 3072  ;;  %p1333_p3 = scmp.lt.s32.totalorder %s1649_s17, %s1331_s14 }
  0x58   : > { %p1328_p11 = pnand %p1326_p8, %p1312_p0  ;;  %p1334_p7 = scmp.lt.s32.totalorder %s1332_s23, %s1325_s9 }
  0x5a   : > { %p1329_p13 = pneg %p1328_p11  ;;  %p1335_p9 = por %p1334_p7, %p1333_p3 }
  0x5c   : > { %p1336_p12 = pnand %p1335_p9, %p1329_p13 }
  0x5e   : > { %1339 = shalt.err (!%p1336_p12)
}
  0x5f   : > { %s2135_s15 = smov 64   ;;  %p2136_p0 = scmp.ne.s32.totalorder %s2130_s26, 0 }
  0x60   : > { %1184 = dma.hbm_to_vmem [thread:$0]  (!%p1640_p10), %s1647_s13, 1536, %s1649_s17, %s1651_s29, %s2135_s15, %s2135_s15, %s1475_s16  }
  0x61   : > { %237 = sbr.rel (%p2136_p0) target bundleno = 447 (0x1bf), region = 32  ;;  %s1685_s30 = sand.u32 (!%p2136_p0), 1, %s1462_s19  }
  0x62   : > { %s1156_s6 = smul.u32 (!%p2136_p0), 96, %s1685_s30  ;;  %s240_s12 = scalar_lea.sflag (!%p2136_p0), [#allocation3], %s1685_s30 }
  0x63   : > { %p2137_p5 = scmp.ne.s32.totalorder (!%p2136_p0), %s2128_s24, 0 }
  0x64   : > { %s1689_s28 = scalar_lea.vmem (!%p2136_p0), [#allocation2], %s1156_s6 }
  0x68   : > { %1441 = dma.done.wait (%p2137_p5), %s240_s12, 1536  }
  0x69   : > { %1443 = vsyncadd (%p2137_p5), %s240_s12, 4294965760  ;;  %p2138_p10 = scmp.eq.s32.totalorder %s1533_s22, 0 }
  0x6b   : > { %1445 = dma.done.wait (%p2138_p10), [#allocation6], 336   ;;  %p2139_p1 = pmov %p2138_p10 }
  0x6c   : > { %v1239_v0 = vld [vmem:[#allocation5] sm:$0xff]   ;;  %v1240_v1 = vld [vmem:[#allocation5 + $0x8] sm:$0xff]   ;;  %vm402_vm0 = vcmask 293888   ;;  %v1241_v2 = vld [vmem:[#allocation5 + $0x10] ss:$0 sps:$4 sm:$0x33]   ;;  %v621_v16 = vlaneseq }
  0x6d   : > { %1447 = vsyncadd (%p2139_p1), [#allocation6], 4294966960  ;;  %1117 = vmatprep.subr.bf16.mxu0 %v1239_v0  ;;  %v1242_v3 = vld [vmem:[%s1689_s28] sm:$0xff]   ;;  %1147 = vmatprep.subr.bf16.mxu1 %v1239_v0  ;;  %vm439_vm1 = vcmask 1041408   ;;  %v1243_v5 = vld [vmem:[%s1689_s28 + $0x8] sm:$0xff]   ;;  %s620_s24 = smul.u32 192, %s1533_s22 }
  0x6e   : > { %1118 = vmatpush3.bf16.msra.mxu0 %v1239_v0  ;;  %1150 = vmatpush3.bf16.msra.mxu1 %v1239_v0  ;;  %v441_v4 = vsel %vm439_vm1, %v1241_v2, 0  ;;  %v1244_v6 = vld [vmem:[%s1689_s28 + $0x10] sm:$0xff]   ;;  %v1249_v8 = vld [vmem:[%s1689_s28 + $0x38] sm:$0xff]   ;;  %v1250_v9 = vld [vmem:[%s1689_s28 + $0x40] sm:$0xff]   ;;  %v1723_v17 = vshrl.u32 %v621_v16, 7  ;;  %s1157_s26 = smul.u32 192, %s1685_s30 }
  0x6f   : > { %1119 = vmatprep.subr.bf16.mxu0 %v1240_v1  ;;  %1123 = vmatprep.mubr.msk.bf16.mxu0 %vm402_vm0, %v1242_v3  ;;  %v1248_v7 = vld [vmem:[%s1689_s28 + $0x30] sm:$0xff]   ;;  %v1245_v10 = vld [vmem:[%s1689_s28 + $0x18] sm:$0xff]   ;;  %v1251_v11 = vld [vmem:[%s1689_s28 + $0x48] sm:$0xff]   ;;  %v1727_v19 = vstv %s620_s24  ;;  %s1101_s11 = smul.u32 3072, %s1533_s22  ;;  %s852_s10 = scalar_lea.sflag [#allocation4], %s1685_s30 }
  0x70   : > { %1148 = vmatprep.subr.bf16.mxu1 %v1240_v1  ;;  %1135 = vmatprep.mubr.msk.bf16.mxu1 %vm402_vm0, %v1248_v7  ;;  %v1246_v12 = vld [vmem:[%s1689_s28 + $0x20] sm:$0xff]   ;;  %v1252_v13 = vld [vmem:[%s1689_s28 + $0x50] sm:$0xff]   ;;  %v1247_v14 = vld [vmem:[%s1689_s28 + $0x28] sm:$0xff]   ;;  %v624_v18 = vadd.s32 16, %v1723_v17  ;;  %v625_v20 = vadd.s32 24, %v1723_v17  ;;  %v623_v21 = vadd.s32 8, %v1723_v17  ;;  %v647_v23 = vadd.s32 %v1727_v19, %v1723_v17 }
  0x71   : > { %v1253_v15 = vld [vmem:[%s1689_s28 + $0x58] sm:$0xff]   ;;  %v626_v26 = vadd.s32 32, %v1723_v17  ;;  %v628_v27 = vadd.s32 48, %v1723_v17  ;;  %v629_v28 = vadd.s32 56, %v1723_v17  ;;  %v627_v29 = vadd.s32 40, %v1723_v17  ;;  %s1786_s16 = scalar_lea.vmem [#allocation8], %s1157_s26  ;;  %s1949_s9 = scalar_lea.hbm %s2120_s3, %s1101_s11 }
  0x72   : > { %1120 = vmatpush3.bf16.msra.mxu0 %v1240_v1  ;;  %1151 = vmatpush3.bf16.msra.mxu1 %v1240_v1  ;;  %v649_v22 = vadd.s32 %v1727_v19, %v624_v18  ;;  %v1735_v24 = vadd.s32 %v1727_v19, %v625_v20  ;;  %v1738_v25 = vadd.s32 %v1727_v19, %v623_v21  ;;  %v1745_v30 = vld [vmem:[#allocation7] ss:$0 sm:$0xff]  ;;  %vm671_vm3 = vcmp.lt.s32.totalorder %v647_v23, 512  ;;  %s875_s13 = sshll.u32 %s1786_s16, 4  ;;  %s1477_s23 = smov [#allocation8]   ;;  %s1937_s13 = int_to_ptr.vmem [resolvable:$true] %s875_s13 }
  0x73   : > { %1153 = vmatprep.subr.msk.bf16.mxu0 %vm439_vm1, %v1241_v2  ;;  %1154 = vmatprep.subr.msk.bf16.mxu1 %vm439_vm1, %v1241_v2  ;;  %v1750_v31 = vadd.s32 %v1727_v19, %v626_v26  ;;  %v1753_v33 = vadd.s32 %v1727_v19, %v628_v27  ;;  %v1756_v34 = vadd.s32 %v1727_v19, %v629_v28  ;;  %v632_v36 = vadd.s32 80, %v1723_v17  ;;  %s1340_s14 = scalar_lea.vmem %s1937_s13, 3072  ;;  %s1344_s15 = sshll.u32 %s1477_s23, 4  ;;  %s1345_s15 = int_to_ptr.vmem [resolvable:$false] %s1344_s15 }
  0x74   : > { %vm673_vm2 = vcmp.lt.s32.totalorder %v649_v22, 512  ;;  %vm674_vm4 = vcmp.lt.s32.totalorder %v1735_v24, 512  ;;  %vm672_vm5 = vcmp.lt.s32.totalorder %v1738_v25, 512  ;;  %v1759_v35 = vadd.s32 %v1727_v19, %v627_v29  ;;  %p1341_p2 = scmp.ne.s32.totalorder %s1937_s13, %s1340_s14  ;;  %s1346_s6 = scalar_lea.vmem %s1345_s15, 6144 }
  0x75   : > { %v630_v40 = vadd.s32 64, %v1723_v17  ;;  %v633_v41 = vadd.s32 88, %v1723_v17  ;;  %v631_v46 = vadd.s32 72, %v1723_v17  ;;  %v636_v47 = vadd.s32 112, %v1723_v17  ;;  %p1347_p11 = scmp.lt.s32.totalorder %s1937_s13, %s1345_s15  ;;  %p1348_p13 = scmp.lt.s32.totalorder %s1346_s6, %s1340_s14 }
  0x76   : > { %1122 = vmatpush3.bf16.msra.mxu0 %v441_v4  ;;  %1152 = vmatpush3.bf16.msra.mxu1 %v441_v4  ;;  %vm675_vm6 = vcmp.lt.s32.totalorder %v1750_v31, 512  ;;  %vm677_vm7 = vcmp.lt.s32.totalorder %v1753_v33, 512  ;;  %v634_v59 = vadd.s32 96, %v1723_v17  ;;  %vm676_vm8 = vcmp.lt.s32.totalorder %v1759_v35, 512  ;;  %p1342_p4 = pnand %p1341_p2, %p1630_p6 }
  0x77   : > { %v1791_v61 = vadd.s32 %v1727_v19, %v632_v36  ;;  %v1803_v2 = vadd.s32 %v1727_v19, %v630_v40  ;;  %v1806_v3 = vadd.s32 %v1727_v19, %v633_v41  ;;  %vm678_vm9 = vcmp.lt.s32.totalorder %v1756_v34, 512  ;;  %p1349_p3 = por %p1348_p13, %p1347_p11 }
  0x78   : > { %v635_v7 = vadd.s32 104, %v1723_v17  ;;  %p1343_p8 = pneg %p1342_p4 }
  0x79   : > { %1124 = vmatmul.mubr.msk.bf16.vlgmr.msra.gmra.mrb[0].mxu0 %vm402_vm0, %v1243_v5  ;;  %1136 = vmatmul.mubr.msk.bf16.vlgmr.msra.gmra.mrb[0].mxu1 %vm402_vm0, %v1249_v8  ;;  %v1815_v5 = vadd.s32 %v1727_v19, %v631_v46  ;;  %vm679_vm10 = vcmp.lt.s32.totalorder %v1803_v2, 512  ;;  %vm681_vm11 = vcmp.lt.s32.totalorder %v1791_v61, 512  ;;  %vm682_vm12 = vcmp.lt.s32.totalorder %v1806_v3, 512 }
  0x7a   : > { %1127 = vmatprep.mubr.msk.bf16.mxu0 %vm402_vm0, %v1244_v6  ;;  %1139 = vmatprep.mubr.msk.bf16.mxu1 %vm402_vm0, %v1250_v9  ;;  %v637_v6 = vadd.s32 120, %v1723_v17  ;;  %p1350_p7 = pnand %p1349_p3, %p1343_p8 }
  0x7b   : > { %vm680_vm13 = vcmp.lt.s32.totalorder %v1815_v5, 512 }
  0x81   : > { %1128 = vmatmul.mubr.msk.bf16.gmra.mrb[4].mxu0 %vm402_vm0, %v1245_v10  ;;  %1140 = vmatmul.mubr.msk.bf16.gmra.mrb[4].mxu1 %vm402_vm0, %v1251_v11  ;;  %v1826_v11 = vadd.s32 %v1727_v19, %v636_v47 }
  0x82   : > { %1131 = vmatprep.mubr.msk.bf16.mxu0 %vm402_vm0, %v1246_v12  ;;  %1143 = vmatprep.mubr.msk.bf16.mxu1 %vm402_vm0, %v1252_v13  ;;  %v1829_v12 = vadd.s32 %v1727_v19, %v634_v59 }
  0x84   : > { %vm683_vm14 = vcmp.lt.s32.totalorder %v1829_v12, 512 }
  0x89   : > { %1132 = vmatmul.mubr.msk.bf16.gmra.mrb[8].mxu0 %vm402_vm0, %v1247_v14  ;;  %1144 = vmatmul.mubr.msk.bf16.gmra.mrb[8].mxu1 %vm402_vm0, %v1253_v15  ;;  %vm685_vm0 = vcmp.lt.s32.totalorder %v1826_v11, 512 }
 0x14c   : > { %v1125_v32 = vpop.f32.mrb[0].mxu0  ;;  %v1137_v37 = vpop.f32.mrb[0].mxu1 }
 0x14d   : > { %v486_v38 = vadd.f32 %v1125_v32, %v1745_v30  ;;  %v477_v39 = vpop.f32.mrb[1].mxu0  ;;  %v1766_v42 = vadd.f32 %v1137_v37, %v1745_v30  ;;  %v525_v43 = vpop.f32.mrb[1].mxu1 }
 0x14e   : > { %v478_v44 = vadd.f32 %v1745_v30, %v477_v39  ;;  %v1126_v45 = vpop.f32.mrb[2].mxu0  ;;  %v1772_v48 = vadd.f32 %v1745_v30, %v525_v43  ;;  %v1138_v49 = vpop.f32.mrb[2].mxu1 }
 0x14f   : > { %v574_v50 = vmax.f32 %v486_v38, 0.0  ;;  %v489_v51 = vadd.f32 %v1126_v45, %v1745_v30  ;;  %v480_v52 = vpop.f32.mrb[3].mxu0  ;;  %v586_v53 = vmax.f32 %v1766_v42, 0.0  ;;  %v1778_v54 = vadd.f32 %v1138_v49, %v1745_v30  ;;  %v528_v55 = vpop.f32.mrb[3].mxu1 }
 0x150   : > { %v572_v56 = vmax.f32 %v478_v44, 0.0  ;;  %v481_v57 = vadd.f32 %v1745_v30, %v480_v52  ;;  %v584_v58 = vmax.f32 %v1772_v48, 0.0  ;;  %v1798_v63 = vadd.f32 %v1745_v30, %v528_v55 }
 0x151   : > { %598 = vst [vmem:[%s1786_s16 + $0x10] sm:$0xff] %v574_v50  ;;  %v575_v60 = vmax.f32 %v489_v51, 0.0  ;;  %610 = vst [vmem:[%s1786_s16 + $0x70] sm:$0xff] %v586_v53  ;;  %v587_v62 = vmax.f32 %v1778_v54, 0.0  ;;  %v745_v4 = vsel %vm673_vm2, %v574_v50, 0.0  ;;  %v1859_v51 = vadd.s32 %v1727_v19, %v637_v6 }
 0x152   : > { %596 = vst [vmem:[%s1786_s16] sm:$0xff] %v572_v56  ;;  %v743_v0 = vsel %vm671_vm3, %v572_v56, 0.0  ;;  %v573_v1 = vmax.f32 %v481_v57, 0.0  ;;  %608 = vst [vmem:[%s1786_s16 + $0x60] sm:$0xff] %v584_v58  ;;  %v585_v20 = vmax.f32 %v1798_v63, 0.0  ;;  %v799_v22 = vmul.f32 %v745_v4, %v745_v4 }
 0x153   : > { %599 = vst [vmem:[%s1786_s16 + $0x18] sm:$0xff] %v575_v60  ;;  %611 = vst [vmem:[%s1786_s16 + $0x78] sm:$0xff] %v587_v62  ;;  %v797_v8 = vmul.f32 %v743_v0, %v743_v0  ;;  %v746_v23 = vsel %vm674_vm4, %v575_v60, 0.0  ;;  %v1862_v52 = vadd.s32 %v1727_v19, %v635_v7  ;;  %v755_v2 = vsel %vm683_vm14, %v584_v58, 0.0 }
 0x154   : > { %597 = vst [vmem:[%s1786_s16 + $0x8] sm:$0xff] %v573_v1  ;;  %v744_v9 = vsel %vm672_vm5, %v573_v1, 0.0  ;;  %v1129_v10 = vpop.f32.mrb[4].mxu0  ;;  %v1141_v13 = vpop.f32.mrb[4].mxu1  ;;  %609 = vst [vmem:[%s1786_s16 + $0x68] sm:$0xff] %v585_v20  ;;  %v800_v44 = vmul.f32 %v746_v23, %v746_v23  ;;  %v638_v1 = vadd.s32 128, %v1723_v17 }
 0x155   : > { %v767_v14 = vadd.f32 %v744_v9, %v743_v0  ;;  %v798_v15 = vmul.f32 %v744_v9, %v744_v9  ;;  %v502_v16 = vadd.f32 %v1129_v10, %v1745_v30  ;;  %v493_v18 = vpop.f32.mrb[5].mxu0  ;;  %v541_v21 = vpop.f32.mrb[5].mxu1  ;;  %v1837_v27 = vadd.f32 %v1141_v13, %v1745_v30 }
 0x156   : > { %v494_v25 = vadd.f32 %v1745_v30, %v493_v18  ;;  %v1130_v26 = vpop.f32.mrb[6].mxu0  ;;  %v1142_v28 = vpop.f32.mrb[6].mxu1  ;;  %v1849_v43 = vadd.f32 %v1745_v30, %v541_v21  ;;  %vm684_vm15 = vcmp.lt.s32.totalorder %v1862_v52, 512  ;;  %vm686_vm1 = vcmp.lt.s32.totalorder %v1859_v51, 512 }
 0x157   : > { %v768_v29 = vadd.f32 %v767_v14, %v745_v4  ;;  %v821_v32 = vadd.f32 %v798_v15, %v797_v8  ;;  %v578_v36 = vmax.f32 %v502_v16, 0.0  ;;  %v505_v37 = vadd.f32 %v1130_v26, %v1745_v30  ;;  %v496_v38 = vpop.f32.mrb[7].mxu0  ;;  %v1844_v24 = vpop.f32.mrb[7].mxu1 }
 0x158   : > { %v576_v39 = vmax.f32 %v494_v25, 0.0  ;;  %v497_v40 = vadd.f32 %v1745_v30, %v496_v38  ;;  %v590_v41 = vmax.f32 %v1837_v27, 0.0  ;;  %v588_v0 = vmax.f32 %v1849_v43, 0.0 }
 0x159   : > { %v822_v45 = vadd.f32 %v821_v32, %v799_v22  ;;  %602 = vst [vmem:[%s1786_s16 + $0x30] sm:$0xff] %v578_v36  ;;  %v769_v46 = vadd.f32 %v768_v29, %v746_v23  ;;  %v579_v47 = vmax.f32 %v505_v37, 0.0  ;;  %v749_v55 = vsel %vm677_vm7, %v578_v36, 0.0 }
 0x15a   : > { %600 = vst [vmem:[%s1786_s16 + $0x20] sm:$0xff] %v576_v39  ;;  %v747_v49 = vsel %vm675_vm6, %v576_v39, 0.0  ;;  %v577_v50 = vmax.f32 %v497_v40, 0.0  ;;  %614 = vst [vmem:[%s1786_s16 + $0x90] sm:$0xff] %v590_v41  ;;  %v803_v13 = vmul.f32 %v749_v55, %v749_v55  ;;  %v1884_v16 = vadd.f32 %v1142_v28, %v1745_v30 }
 0x15b   : > { %v770_v56 = vadd.f32 %v769_v46, %v747_v49  ;;  %v801_v57 = vmul.f32 %v747_v49, %v747_v49  ;;  %v823_v59 = vadd.f32 %v822_v45, %v800_v44  ;;  %603 = vst [vmem:[%s1786_s16 + $0x38] sm:$0xff] %v579_v47  ;;  %v750_v35 = vsel %vm678_vm9, %v579_v47, 0.0  ;;  %612 = vst [vmem:[%s1786_s16 + $0x80] sm:$0xff] %v588_v0 }
 0x15c   : > { %601 = vst [vmem:[%s1786_s16 + $0x28] sm:$0xff] %v577_v50  ;;  %v748_v31 = vsel %vm676_vm8, %v577_v50, 0.0  ;;  %v1133_v60 = vpop.f32.mrb[8].mxu0  ;;  %v1145_v4 = vpop.f32.mrb[8].mxu1  ;;  %v1890_v36 = vadd.s32 144, %v1723_v17  ;;  %v591_v28 = vmax.f32 %v1884_v16, 0.0  ;;  %v804_v37 = vmul.f32 %v750_v35, %v750_v35 }
 0x15d   : > { %v824_v6 = vadd.f32 %v823_v59, %v801_v57  ;;  %v771_v33 = vadd.f32 %v770_v56, %v748_v31  ;;  %v802_v7 = vmul.f32 %v748_v31, %v748_v31  ;;  %v518_v8 = vadd.f32 %v1133_v60, %v1745_v30  ;;  %v509_v9 = vpop.f32.mrb[9].mxu0  ;;  %v557_v10 = vpop.f32.mrb[9].mxu1 }
 0x15e   : > { %v510_v14 = vadd.f32 %v1745_v30, %v509_v9  ;;  %v1134_v15 = vpop.f32.mrb[10].mxu0  ;;  %v1146_v18 = vpop.f32.mrb[10].mxu1  ;;  %v1899_v46 = vadd.s32 %v1727_v19, %v638_v1  ;;  %615 = vst [vmem:[%s1786_s16 + $0x98] sm:$0xff] %v591_v28  ;;  %v639_v47 = vadd.s32 136, %v1723_v17  ;;  %v1919_v31 = vadd.f32 %v1745_v30, %v1844_v24 }
 0x15f   : > { %v772_v21 = vadd.f32 %v771_v33, %v749_v55  ;;  %v825_v22 = vadd.f32 %v824_v6, %v802_v7  ;;  %v582_v23 = vmax.f32 %v518_v8, 0.0  ;;  %v521_v25 = vadd.f32 %v1134_v15, %v1745_v30  ;;  %v512_v26 = vpop.f32.mrb[11].mxu0  ;;  %v560_v34 = vpop.f32.mrb[11].mxu1 }
 0x160   : > { %v580_v29 = vmax.f32 %v510_v14, 0.0  ;;  %v513_v32 = vadd.f32 %v1745_v30, %v512_v26  ;;  %v1924_v61 = vadd.f32 %v1145_v4, %v1745_v30  ;;  %v589_v3 = vmax.f32 %v1919_v31, 0.0 }
 0x161   : > { %v826_v38 = vadd.f32 %v825_v22, %v803_v13  ;;  %606 = vst [vmem:[%s1786_s16 + $0x50] sm:$0xff] %v582_v23  ;;  %v773_v39 = vadd.f32 %v772_v21, %v750_v35  ;;  %v583_v40 = vmax.f32 %v521_v25, 0.0  ;;  %v753_v56 = vsel %vm681_vm11, %v582_v23, 0.0 }
 0x162   : > { %604 = vst [vmem:[%s1786_s16 + $0x40] sm:$0xff] %v580_v29  ;;  %v751_v44 = vsel %vm679_vm10, %v580_v29, 0.0  ;;  %v581_v45 = vmax.f32 %v513_v32, 0.0  ;;  %v1928_v60 = vadd.f32 %v1745_v30, %v557_v10  ;;  %v1931_v5 = vadd.f32 %v1146_v18, %v1745_v30  ;;  %613 = vst [vmem:[%s1786_s16 + $0x88] sm:$0xff] %v589_v3 }
 0x163   : > { %v774_v49 = vadd.f32 %v773_v39, %v751_v44  ;;  %v805_v50 = vmul.f32 %v751_v44, %v751_v44  ;;  %v827_v55 = vadd.f32 %v826_v38, %v804_v37  ;;  %607 = vst [vmem:[%s1786_s16 + $0x58] sm:$0xff] %v583_v40  ;;  %v754_v57 = vsel %vm682_vm12, %v583_v40, 0.0 }
 0x164   : > { %605 = vst [vmem:[%s1786_s16 + $0x48] sm:$0xff] %v581_v45  ;;  %v752_v59 = vsel %vm680_vm13, %v581_v45, 0.0  ;;  %v1934_v24 = vadd.f32 %v1745_v30, %v560_v34  ;;  %v807_v1 = vmul.f32 %v753_v56, %v753_v56  ;;  %v594_v7 = vmax.f32 %v1924_v61, 0.0 }
 0x165   : > { %v828_v48 = vadd.f32 %v827_v55, %v805_v50  ;;  %v775_v12 = vadd.f32 %v774_v49, %v752_v59  ;;  %v806_v58 = vmul.f32 %v752_v59, %v752_v59  ;;  %v641_v4 = vadd.s32 152, %v1723_v17 }
 0x166   : > { %v592_v8 = vmax.f32 %v1928_v60, 0.0  ;;  %v595_v30 = vmax.f32 %v1931_v5, 0.0  ;;  %v593_v9 = vmax.f32 %v1934_v24, 0.0  ;;  %v808_v10 = vmul.f32 %v754_v57, %v754_v57  ;;  %618 = vst [vmem:[%s1786_s16 + $0xb0] sm:$0xff] %v594_v7 }
 0x167   : > { %v776_v6 = vadd.f32 %v775_v12, %v753_v56  ;;  %v829_v33 = vadd.f32 %v828_v48, %v806_v58  ;;  %v809_v14 = vmul.f32 %v755_v2, %v755_v2  ;;  %v756_v15 = vsel %vm684_vm15, %v585_v20, 0.0 }
 0x168   : > { %v664_v18 = vadd.s32 %v1727_v19, %v639_v47  ;;  %616 = vst [vmem:[%s1786_s16 + $0xa0] sm:$0xff] %v592_v8  ;;  %619 = vst [vmem:[%s1786_s16 + $0xb8] sm:$0xff] %v595_v30  ;;  %vm687_vm2 = vcmp.lt.s32.totalorder %v1899_v46, 512  ;;  %v642_v63 = vadd.s32 160, %v1723_v17 }
 0x169   : > { %v830_v13 = vadd.f32 %v829_v33, %v807_v1  ;;  %v777_v35 = vadd.f32 %v776_v6, %v754_v57  ;;  %617 = vst [vmem:[%s1786_s16 + $0xa8] sm:$0xff] %v593_v9 }
 0x16b   : > { %v778_v21 = vadd.f32 %v777_v35, %v755_v2  ;;  %v831_v22 = vadd.f32 %v830_v13, %v808_v10 }
 0x16c   : > { %1353 = shalt.err (!%p1350_p7)
}
 0x16d   : > { %s1354_s12 = scalar_lea.hbm %s1949_s9, 3072  ;;  %s1358_s26 = scalar_lea.hbm %s2120_s3, 9216 }
 0x16e   : > { %p1355_p9 = scmp.ne.s32.totalorder %s1949_s9, %s1354_s12  ;;  %p1359_p5 = scmp.lt.u32.totalorder %s1949_s9, %s2120_s3 }
 0x16f   : > { %p1360_p10 = scmp.lt.u32.totalorder %s1358_s26, %s1354_s12  ;;  %p1362_p2 = scmp.lt.u32.totalorder %s1354_s12, %s1949_s9 }
 0x170   : > { %p1356_p12 = pnand %p1355_p9, %p1630_p6 }
 0x171   : > { %p1361_p1 = por %p1360_p10, %p1359_p5 }
 0x172   : > { %p1357_p0 = pneg %p1356_p12 }
 0x173   : > { %p1363_p4 = por %p1362_p2, %p1361_p1 }
 0x175   : > { %p1364_p8 = pnand %p1363_p4, %p1357_p0 }
 0x177   : > { %1367 = shalt.err (!%p1364_p8)
}
 0x178   : > { %s1478_s17 = smov 128   ;;  %s1479_s29 = smov 8   ;;  %v757_v20 = vsel %vm685_vm0, %v586_v53, 0.0  ;;  %v665_v52 = vadd.s32 %v1727_v19, %v1890_v36  ;;  %v832_v23 = vadd.f32 %v831_v22, %v809_v14  ;;  %v779_v25 = vadd.f32 %v778_v21, %v756_v15 }
 0x179   : > { %1168 = dma.vmem_to_hbm [thread:$0]  (%p1630_p6), %s1937_s13, 3072, %s1949_s9, %s852_s10, %s1478_s17, %s1478_s17, %s1479_s29   ;;  %v810_v26 = vmul.f32 %v756_v15, %v756_v15  ;;  %v666_v34 = vadd.s32 %v1727_v19, %v641_v4  ;;  %v758_v29 = vsel %vm686_vm1, %v587_v62, 0.0  ;;  %v759_v42 = vsel %vm687_vm2, %v588_v0, 0.0 }
 0x17a   : > { %vm688_vm3 = vcmp.lt.s32.totalorder %v664_v18, 512  ;;  %v643_v53 = vadd.s32 168, %v1723_v17  ;;  %v811_v11 = vmul.f32 %v757_v20, %v757_v20  ;;  %v780_v32 = vadd.f32 %v779_v25, %v757_v20  ;;  %s1063_s13 = sshll.u32 %s1685_s30, 3  ;;  %s856_s9 = sand.u32 1, %s1533_s22  }
 0x17b   : > { %v833_v36 = vadd.f32 %v832_v23, %v810_v26  ;;  %v667_v37 = vadd.s32 %v1727_v19, %v642_v63  ;;  %vm689_vm4 = vcmp.lt.s32.totalorder %v665_v52, 512  ;;  %v644_v38 = vadd.s32 176, %v1723_v17  ;;  %s1096_s10 = sshll.u32 %s1533_s22, 7  ;;  %s280_s14 = scalar_lea.vmem [#allocation9], %s1063_s13 }
 0x17c   : > { %v812_v54 = vmul.f32 %v758_v29, %v758_v29  ;;  %v781_v51 = vadd.f32 %v780_v32, %v758_v29  ;;  %v813_v62 = vmul.f32 %v759_v42, %v759_v42  ;;  %vm690_vm5 = vcmp.lt.s32.totalorder %v666_v34, 512  ;;  %s891_s23 = sshll.u32 %s280_s14, 4  ;;  %s2034_s15 = scalar_lea.vmem [#allocation11], %s1063_s13  ;;  %s2042_s23 = int_to_ptr.vmem [resolvable:$true] %s891_s23 }
 0x17d   : > { %v834_v39 = vadd.f32 %v833_v36, %v811_v11  ;;  %v760_v43 = vsel %vm688_vm3, %v589_v3, 0.0  ;;  %v645_v0 = vadd.s32 184, %v1723_v17  ;;  %vm691_vm6 = vcmp.lt.s32.totalorder %v667_v37, 512  ;;  %s904_s6 = sshll.u32 %s2034_s15, 4  ;;  %s2040_s28 = scalar_lea.hbm %s2121_s4, %s1096_s10  ;;  %s2049_s6 = int_to_ptr.vmem [resolvable:$true] %s904_s6 }
 0x17e   : > { %v782_v40 = vadd.f32 %v781_v51, %v759_v42  ;;  %v668_v45 = vadd.s32 %v1727_v19, %v643_v53  ;;  %v761_v46 = vsel %vm689_vm4, %v590_v41, 0.0  ;;  %v669_v47 = vadd.s32 %v1727_v19, %v644_v38  ;;  %s2047_s26 = scalar_lea.hbm %s2122_s5, %s1096_s10  ;;  %s2051_s16 = scalar_lea.sflag [#allocation10], %s856_s9 }
 0x17f   : > { %v835_v44 = vadd.f32 %v834_v39, %v812_v54  ;;  %v814_v55 = vmul.f32 %v760_v43, %v760_v43  ;;  %v762_v2 = vsel %vm690_vm5, %v591_v28, 0.0  ;;  %v763_v56 = vsel %vm691_vm6, %v592_v8, 0.0  ;;  %s1368_s11 = scalar_lea.vmem %s2042_s23, 128  ;;  %s1480_s17 = smov [#allocation9]  }
 0x180   : > { %v783_v50 = vadd.f32 %v782_v40, %v760_v43  ;;  %v670_v17 = vadd.s32 %v1727_v19, %v645_v0  ;;  %v815_v57 = vmul.f32 %v761_v46, %v761_v46  ;;  %vm692_vm7 = vcmp.lt.s32.totalorder %v668_v45, 512  ;;  %p1369_p11 = scmp.ne.s32.totalorder %s2042_s23, %s1368_s11  ;;  %s1372_s29 = sshll.u32 %s1480_s17, 4  ;;  %s1373_s29 = int_to_ptr.vmem [resolvable:$false] %s1372_s29 }
 0x181   : > { %v836_v49 = vadd.f32 %v835_v44, %v813_v62  ;;  %vm693_vm8 = vcmp.lt.s32.totalorder %v669_v47, 512  ;;  %v816_v27 = vmul.f32 %v762_v2, %v762_v2  ;;  %v817_v12 = vmul.f32 %v763_v56, %v763_v56  ;;  %s1374_s13 = scalar_lea.vmem %s1373_s29, 256  ;;  %p1375_p7 = scmp.lt.s32.totalorder %s2042_s23, %s1373_s29 }
 0x182   : > { %v784_v59 = vadd.f32 %v783_v50, %v761_v46  ;;  %v764_v58 = vsel %vm692_vm7, %v593_v9, 0.0  ;;  %vm694_vm9 = vcmp.lt.s32.totalorder %v670_v17, 512  ;;  %v765_v28 = vsel %vm693_vm8, %v594_v7, 0.0  ;;  %p1370_p13 = pnand %p1369_p11, %p1630_p6  ;;  %p1376_p9 = scmp.lt.s32.totalorder %s1374_s13, %s1368_s11 }
 0x183   : > { %v837_v31 = vadd.f32 %v836_v49, %v814_v55  ;;  %v818_v1 = vmul.f32 %v764_v58, %v764_v58  ;;  %v766_v6 = vsel %vm694_vm9, %v595_v30, 0.0  ;;  %v819_v33 = vmul.f32 %v765_v28, %v765_v28 }
 0x184   : > { %v785_v48 = vadd.f32 %v784_v59, %v762_v2  ;;  %v820_v24 = vmul.f32 %v766_v6, %v766_v6  ;;  %p1371_p3 = pneg %p1370_p13  ;;  %p1377_p12 = por %p1376_p9, %p1375_p7 }
 0x185   : > { %v838_v41 = vadd.f32 %v837_v31, %v815_v57 }
 0x186   : > { %v786_v3 = vadd.f32 %v785_v48, %v763_v56  ;;  %p1378_p0 = pnand %p1377_p12, %p1371_p3 }
 0x187   : > { %v839_v16 = vadd.f32 %v838_v41, %v816_v27 }
 0x188   : > { %v787_v60 = vadd.f32 %v786_v3, %v764_v58 }
 0x189   : > { %v840_v19 = vadd.f32 %v839_v16, %v817_v12 }
 0x18a   : > { %v788_v4 = vadd.f32 %v787_v60, %v765_v28 }
 0x18b   : > { %v841_v8 = vadd.f32 %v840_v19, %v818_v1 }
 0x18c   : > { %v789_v9 = vadd.f32 %v788_v4, %v766_v6 }
 0x18d   : > { %v842_v10 = vadd.f32 %v841_v8, %v819_v33 }
 0x18e   : > { %v790_v13 = vrot.slane %v789_v9, 4 }
 0x18f   : > { %v843_v35 = vadd.f32 %v842_v10, %v820_v24 }
 0x190   : > { %v791_v14 = vadd.f32 %v790_v13, %v789_v9 }
 0x191   : > { %v844_v61 = vrot.slane %v843_v35, 4 }
 0x192   : > { %v792_v7 = vrot.slane %v791_v14, 2 }
 0x193   : > { %v845_v15 = vadd.f32 %v844_v61, %v843_v35 }
 0x194   : > { %v793_v18 = vadd.f32 %v792_v7, %v791_v14 }
 0x195   : > { %v846_v21 = vrot.slane %v845_v15, 2 }
 0x196   : > { %v794_v30 = vrot.slane %v793_v18, 1 }
 0x197   : > { %v847_v5 = vadd.f32 %v846_v21, %v845_v15 }
 0x198   : > { %v795_v22 = vadd.f32 %v794_v30, %v793_v18 }
 0x199   : > { %v848_v63 = vrot.slane %v847_v5, 1 }
 0x19a   : > { %796 = vst [vmem:[%s280_s14] sm:$0xff] %v795_v22 }
 0x19b   : > { %v849_v20 = vadd.f32 %v848_v63, %v847_v5 }
 0x19c   : > { %1381 = shalt.err (!%p1378_p0)
}
 0x19d   : > { %s1382_s9 = scalar_lea.hbm %s2040_s28, 128  ;;  %s1386_s12 = scalar_lea.hbm %s2121_s4, 384 }
 0x19e   : > { %p1383_p5 = scmp.ne.s32.totalorder %s2040_s28, %s1382_s9  ;;  %p1387_p2 = scmp.lt.u32.totalorder %s2040_s28, %s2121_s4 }
 0x19f   : > { %p1388_p4 = scmp.lt.u32.totalorder %s1386_s12, %s1382_s9  ;;  %p1390_p11 = scmp.lt.u32.totalorder %s1382_s9, %s2040_s28 }
 0x1a0   : > { %p1384_p10 = pnand %p1383_p5, %p1630_p6 }
 0x1a1   : > { %p1389_p8 = por %p1388_p4, %p1387_p2 }
 0x1a2   : > { %p1385_p1 = pneg %p1384_p10 }
 0x1a3   : > { %p1391_p13 = por %p1390_p11, %p1389_p8 }
 0x1a5   : > { %p1392_p3 = pnand %p1391_p13, %p1385_p1 }
 0x1a7   : > { %1395 = shalt.err (!%p1392_p3)
}
 0x1a8   : > { %1169 = dma.vmem_to_hbm [thread:$0]  (%p1630_p6), %s2042_s23, 128, %s2040_s28, %s2051_s16   ;;  %850 = vst [vmem:[%s2034_s15] sm:$0xff] %v849_v20 }
 0x1a9   : > { %s1396_s24 = scalar_lea.vmem %s2049_s6, 128  ;;  %s1481_s11 = smov [#allocation11]  }
 0x1aa   : > { %p1397_p7 = scmp.ne.s32.totalorder %s2049_s6, %s1396_s24  ;;  %s1400_s17 = sshll.u32 %s1481_s11, 4  ;;  %s1401_s17 = int_to_ptr.vmem [resolvable:$false] %s1400_s17 }
 0x1ab   : > { %s1402_s29 = scalar_lea.vmem %s1401_s17, 256  ;;  %p1403_p0 = scmp.lt.s32.totalorder %s2049_s6, %s1401_s17 }
 0x1ac   : > { %p1398_p9 = pnand %p1397_p7, %p1630_p6  ;;  %p1404_p5 = scmp.lt.s32.totalorder %s1402_s29, %s1396_s24 }
 0x1ae   : > { %p1399_p12 = pneg %p1398_p9  ;;  %p1405_p10 = por %p1404_p5, %p1403_p0 }
 0x1b0   : > { %p1406_p1 = pnand %p1405_p10, %p1399_p12 }
 0x1b2   : > { %1409 = shalt.err (!%p1406_p1)
}
 0x1b3   : > { %s1410_s23 = scalar_lea.hbm %s2047_s26, 128  ;;  %s1414_s13 = scalar_lea.hbm %s2122_s5, 384 }
 0x1b4   : > { %p1411_p2 = scmp.ne.s32.totalorder %s2047_s26, %s1410_s23  ;;  %p1415_p11 = scmp.lt.u32.totalorder %s2047_s26, %s2122_s5 }
 0x1b5   : > { %p1416_p13 = scmp.lt.u32.totalorder %s1414_s13, %s1410_s23  ;;  %p1418_p7 = scmp.lt.u32.totalorder %s1410_s23, %s2047_s26 }
 0x1b6   : > { %p1412_p4 = pnand %p1411_p2, %p1630_p6 }
 0x1b7   : > { %p1417_p3 = por %p1416_p13, %p1415_p11 }
 0x1b8   : > { %p1413_p8 = pneg %p1412_p4 }
 0x1b9   : > { %p1419_p9 = por %p1418_p7, %p1417_p3 }
 0x1bb   : > { %p1420_p12 = pnand %p1419_p9, %p1413_p8 }
 0x1bd   : > { %1423 = shalt.err (!%p1420_p12)
}
 0x1be   : > { %1170 = dma.vmem_to_hbm [thread:$0]  (%p1630_p6), %s2049_s6, 128, %s2047_s26, %s2051_s16  }
 0x1bf PF: > { %p1200_p0 = scmp.ge.s32.totalorder %s1470_s21, 2  ;;  %s916_s14 = sand.u32 1, %s1458_s18  }
 0x1c0   : > { %p2140_p5 = scmp.ne.s32.totalorder %s2129_s25, 0  ;;  %s917_s12 = scalar_lea.sflag [#allocation4], %s916_s14 }
 0x1c2   : > { %p1186_p10 = pnand %p1200_p0, %p2140_p5 }
 0x1c4   : > { %1449 = dma.done.wait (!%p1186_p10), %s917_s12, 3072  }
 0x1c5   : > { %1451 = vsyncadd (!%p1186_p10), %s917_s12, 4294964224  ;;  %s2141_s30 = sadd.s32 4294967294, %s1470_s21  }
 0x1c6   : > { %s925_s22 = sand.u32 1, %s2141_s30  }
 0x1c7   : > { %s926_s24 = scalar_lea.sflag [#allocation10], %s925_s22 }
 0x1c8   : > { %1453 = dma.done.wait (!%p1186_p10), %s926_s24, 256  }
 0x1c9   : > { %1455 = vsyncadd (!%p1186_p10), %s926_s24, 4294967040  ;;  %p23_p6 = scmp.ge.s32.totalorder %s1620_s27, 5   ;;  %s2142_s18 = smov %s1462_s19 }
 0x1ca   : > { %s2143_s19 = smov %s1466_s20  ;;  %s2144_s20 = smov %s1636_s8 }
 0x1cb   : > { %s2145_s21 = smov %s1620_s27  ;;  %25 = sbr.rel (!%p23_p6) target bundleno = 8 (0x8), region = 117 }
 0x1d2   :  { %940 = vsyncpa [#allocation3], 1 }
 0x1d3   :  { %942 = vsyncpa [#allocation3 + $0x1], 1 }
 0x1d4   :  { %943 = vsyncpa [#allocation6], 1 }
 0x1d5   :  { %944 = vsyncpa [#allocation4], 1 }
 0x1d6   :  { %946 = vsyncpa [#allocation4 + $0x1], 1 }
 0x1d7   :  { %947 = vsyncpa [#allocation10], 1 }
 0x1d8   :  { %949 = vsyncpa [#allocation10 + $0x1], 1 }

// kernel: convolution_block_forward.7
= control target key start
LH: loop header
LB: loop body
LE: loop exit
PB: predicated region body
PF: predicated region fallthrough
CT: control target
= control target key end

     0   :  { %8 = vsyncpa [#allocation3], 0  ;;  %s1046_s0 = inlined_call_operand.hbm [shape: f32[576,128], index: 0, kind: input, shape index: {}]   ;;  %s1047_s1 = inlined_call_operand.hbm [shape: f32[1,128], index: 1, kind: input, shape index: {}]   ;;  %s1048_s2 = inlined_call_operand.hbm [shape: f32[1,128], index: 2, kind: input, shape index: {}]   ;;  %s1049_s3 = inlined_call_operand.hbm [shape: f32[576,128], index: 3, kind: output, shape index: {}]  }
   0x1   :  { %10 = vsyncpa [#allocation3 + $0x1], 0 }
   0x2   :  { %11 = vsyncpa [#allocation6], 0 }
   0x3   :  { %12 = vsyncpa [#allocation4], 0 }
   0x4   :  { %14 = vsyncpa [#allocation4 + $0x1], 0  ;;  %s707_s12 = smov 0   ;;  %s709_s13 = smov 0  }
   0x5   :  { %s711_s14 = smov 0   ;;  %s713_s15 = smov 0  }
   0x6 LB: > { %s728_s16 = sadd.s32 4294967295, %s677_s15   ;;  %s432_s17 = sadd.s32 4294967294, %s677_s15   ;;  %s677_s15 = sphi %s713_s15, %s1072_s15   ;;  %s673_s14 = sphi %s711_s14, %s1071_s14   ;;  %s669_s13 = sphi %s709_s13, %s1070_s13   ;;  %s665_s12 = sphi %s707_s12, %s1069_s12  }
   0x7   : > { %s732_s18 = sadd.s32 1, %s677_s15   ;;  %s27_s19 = sadd.s32 1, %s673_s14 }
   0x8   : > { %s24_s20 = ssub.s32 %s677_s15, %s732_s18  ;;  %p34_p0 = scmp.ne.s32.totalorder %s673_s14, %s669_s13 }
   0x9   : > { %p25_p1 = scmp.eq.s32.totalorder %s24_s20, 0  ;;  %p35_p2 = scmp.eq.s32.totalorder %s677_s15, 0 }
   0xa   : > { %p40_p3 = scmp.ne.s32.totalorder %s669_s13, %s665_s12  ;;  %p1050_p4 = scmp.eq.s32.totalorder %s728_s16, 0 }
   0xb   : > { %s744_s21 = scalar_select %p25_p1, %s673_s14, %s27_s19  }
   0xc   : > { %p746_p5 = por %p35_p2, %p34_p0  ;;  %p752_p6 = por %p1050_p4, %p40_p3 }
   0xd   : > { %p106_p7 = scmp.eq.s32.totalorder %s728_s16, 2  ;;  %p112_p8 = scmp.eq.s32.totalorder %s432_s17, 2 }
   0xe   : > { %s1056_s23 = scalar_select %p752_p6, 1, 0 }
   0xf   : > { %p433_p9 = scmp.ge.s32.totalorder %s677_s15, 1  ;;  %p119_p10 = scmp.lt.s32.totalorder %s677_s15, 4 }
  0x10   : > { %p759_p11 = por %p106_p7, %p34_p0  ;;  %p763_p12 = por %p112_p8, %p40_p3 }
  0x11   : > { %p767_p13 = pnand %p433_p9, %p119_p10  ;;  %s679_s27 = smov [#allocation5]  }
  0x12   : > { %s1057_s24 = scalar_select %p759_p11, 1, 0 }
  0x13   : > { %s1058_s25 = scalar_select %p763_p12, 1, 0 }
  0x14   : > { %s1059_s26 = scalar_select %p767_p13, 1, 0 }
  0x15   : > { %p462_p1 = pneg %p767_p13  ;;  %s132_s28 = sshll.u32 %s679_s27, 4  ;;  %s133_s28 = int_to_ptr.vmem [resolvable:$true] %s132_s28 }
  0x16   : > { %p479_p2 = scmp.lt.s32.totalorder %s677_s15, 3  ;;  %s680_s4 = smov [#allocation7]  }
  0x17   : > { %p776_p0 = pnand %p462_p1, %p1050_p4  ;;  %s143_s5 = sshll.u32 %s680_s4, 4  ;;  %s786_s5 = int_to_ptr.vmem [resolvable:$true] %s143_s5 }
  0x18   : > { %p782_p3 = pnand %p479_p2, %p746_p5  ;;  %s521_s8 = scalar_lea.hbm %s1047_s1, 16 }
  0x19   : > { %p522_p7 = scmp.ne.s32.totalorder %s1047_s1, %s521_s8  ;;  %p523_p8 = pneg %p776_p0 }
  0x1a   : > { %s1061_s30 = scalar_select %p782_p3, 1, 0 }
  0x1b   : > { %p524_p5 = pnand %p523_p8, %p522_p7  ;;  %p528_p10 = scmp.lt.u32.totalorder %s521_s8, %s1047_s1 }
  0x1d   : > { %p525_p9 = pneg %p524_p5 }
  0x1f   : > { %p530_p1 = pnand %p528_p10, %p525_p9 }
  0x21   : > { %533 = shalt.err (!%p530_p1)
}
  0x22   : > { %s534_s19 = scalar_lea.vmem %s133_s28, 16  ;;  %s541_s20 = scalar_lea.vmem %s133_s28, 32 }
  0x23   : > { %p535_p2 = scmp.ne.s32.totalorder %s133_s28, %s534_s19  ;;  %p542_p11 = scmp.lt.s32.totalorder %s133_s28, %s133_s28 }
  0x24   : > { %p543_p6 = scmp.lt.s32.totalorder %s541_s20, %s534_s19 }
  0x25   : > { %p537_p4 = pnand %p535_p2, %p523_p8 }
  0x26   : > { %p544_p13 = por %p543_p6, %p542_p11 }
  0x27   : > { %p538_p12 = pneg %p537_p4 }
  0x29   : > { %p545_p3 = pnand %p544_p13, %p538_p12 }
  0x2b   : > { %548 = shalt.err (!%p545_p3)
}
  0x2c   : > { %465 = dma.hbm_to_vmem [thread:$0]  (!%p776_p0), %s1047_s1, 16, %s133_s28, [#allocation6]  }
  0x2d   : > { %s154_s4 = sand.u32 1, %s673_s14   ;;  %s549_s8 = scalar_lea.hbm %s1048_s2, 16 }
  0x2e   : > { %p550_p4 = scmp.ne.s32.totalorder %s1048_s2, %s549_s8  ;;  %p556_p12 = scmp.lt.u32.totalorder %s549_s8, %s1048_s2 }
  0x30   : > { %p552_p6 = pnand %p550_p4, %p523_p8 }
  0x32   : > { %p553_p11 = pneg %p552_p6 }
  0x34   : > { %p558_p13 = pnand %p556_p12, %p553_p11 }
  0x36   : > { %561 = shalt.err (!%p558_p13)
}
  0x37   : > { %s562_s28 = scalar_lea.vmem %s786_s5, 16  ;;  %s569_s19 = scalar_lea.vmem %s786_s5, 32 }
  0x38   : > { %p563_p3 = scmp.ne.s32.totalorder %s786_s5, %s562_s28  ;;  %p570_p9 = scmp.lt.s32.totalorder %s786_s5, %s786_s5 }
  0x39   : > { %p571_p10 = scmp.lt.s32.totalorder %s569_s19, %s562_s28 }
  0x3a   : > { %p565_p7 = pnand %p563_p3, %p523_p8 }
  0x3b   : > { %p572_p1 = por %p571_p10, %p570_p9 }
  0x3c   : > { %p566_p5 = pneg %p565_p7 }
  0x3e   : > { %p573_p2 = pnand %p572_p1, %p566_p5 }
  0x40   : > { %576 = shalt.err (!%p573_p2)
}
  0x41   : > { %468 = dma.hbm_to_vmem [thread:$0]  (!%p776_p0), %s1048_s2, 16, %s786_s5, [#allocation6]  }
  0x42   : > { %s448_s27 = smul.u32 192, %s154_s4  ;;  %s845_s11 = scalar_lea.sflag [#allocation3], %s154_s4 }
  0x43   : > { %s446_s6 = smul.u32 3072, %s677_s15  ;;  %p1062_p0 = scmp.ne.s32.totalorder %s1061_s30, 0 }
  0x44   : > { %s158_s29 = scalar_lea.vmem [#allocation2], %s448_s27  ;;  %s582_s19 = scalar_lea.hbm %s1046_s0, 9216 }
  0x45   : > { %s841_s9 = scalar_lea.hbm %s1046_s0, %s446_s6  ;;  %s165_s10 = sshll.u32 %s158_s29, 4  ;;  %s843_s10 = int_to_ptr.vmem [resolvable:$true] %s165_s10 }
  0x46   : > { %s577_s17 = scalar_lea.hbm %s841_s9, 3072  ;;  %p579_p4 = pneg %p1062_p0 }
  0x47   : > { %p578_p8 = scmp.ne.s32.totalorder %s841_s9, %s577_s17  ;;  %p583_p12 = scmp.lt.u32.totalorder %s841_s9, %s1046_s0 }
  0x48   : > { %p584_p13 = scmp.lt.u32.totalorder %s582_s19, %s577_s17  ;;  %p586_p7 = scmp.lt.u32.totalorder %s577_s17, %s841_s9 }
  0x49   : > { %p580_p6 = pnand %p579_p4, %p578_p8 }
  0x4a   : > { %p585_p3 = por %p584_p13, %p583_p12 }
  0x4b   : > { %p581_p11 = pneg %p580_p6 }
  0x4c   : > { %p587_p5 = por %p586_p7, %p585_p3 }
  0x4e   : > { %p588_p9 = pnand %p587_p5, %p581_p11 }
  0x50   : > { %591 = shalt.err (!%p588_p9)
}
  0x51   : > { %s592_s4 = scalar_lea.vmem %s843_s10, 3072  ;;  %s681_s27 = smov [#allocation2]  }
  0x52   : > { %p593_p10 = scmp.ne.s32.totalorder %s843_s10, %s592_s4  ;;  %s597_s6 = sshll.u32 %s681_s27, 4  ;;  %s598_s6 = int_to_ptr.vmem [resolvable:$false] %s597_s6 }
  0x53   : > { %s599_s7 = scalar_lea.vmem %s598_s6, 6144  ;;  %p600_p8 = scmp.lt.s32.totalorder %s843_s10, %s598_s6 }
  0x54   : > { %p595_p1 = pnand %p593_p10, %p579_p4  ;;  %p601_p6 = scmp.lt.s32.totalorder %s599_s7, %s592_s4 }
  0x56   : > { %p596_p2 = pneg %p595_p1  ;;  %p602_p12 = por %p601_p6, %p600_p8 }
  0x58   : > { %p603_p13 = pnand %p602_p12, %p596_p2 }
  0x5a   : > { %606 = shalt.err (!%p603_p13)
}
  0x5b   : > { %s682_s8 = smov 128   ;;  %s683_s29 = smov 8  }
  0x5c   : > { %472 = dma.hbm_to_vmem [thread:$0]  (!%p1062_p0), %s841_s9, 3072, %s843_s10, %s845_s11, %s682_s8, %s682_s8, %s683_s29  }
  0x5d   : > { %p1063_p4 = scmp.ne.s32.totalorder %s1059_s26, 0 }
  0x5e   : > { %s876_s17 = sand.u32 (!%p1063_p4), 1, %s669_s13   ;;  %p1064_p11 = scmp.ne.s32.totalorder (!%p1063_p4), %s1056_s23, 0 }
  0x5f   : > { %177 = sbr.rel (%p1063_p4) target bundleno = 140 (0x8c), region = 32  ;;  %s180_s28 = scalar_lea.sflag (!%p1063_p4), [#allocation3], %s876_s17 }
  0x60   : > { %s449_s5 = smul.u32 (!%p1063_p4), 192, %s876_s17 }
  0x62   : > { %s882_s19 = scalar_lea.vmem (!%p1063_p4), [#allocation2], %s449_s5 }
  0x66   : > { %652 = dma.done.wait (%p1064_p11), %s180_s28, 3072  }
  0x67   : > { %654 = vsyncadd (%p1064_p11), %s180_s28, 4294964224  ;;  %p1065_p0 = scmp.eq.s32.totalorder %s728_s16, 0 }
  0x69   : > { %656 = dma.done.wait (%p1065_p0), [#allocation6], 32   ;;  %p1066_p3 = pmov %p1065_p0 }
  0x6a   : > { %v216_v0 = vld [vmem:[%s882_s19] sm:$0xff]  ;;  %v217_v4 = vld [vmem:[%s882_s19 + $0x8] sm:$0xff]  ;;  %v218_v5 = vld [vmem:[%s882_s19 + $0x10] sm:$0xff]  ;;  %s923_s23 = scalar_lea.vmem [#allocation8], %s449_s5  ;;  %s447_s26 = smul.u32 3072, %s728_s16 }
  0x6b   : > { %658 = vsyncadd (%p1066_p3), [#allocation6], 4294967264  ;;  %v893_v1 = vld [vmem:[#allocation5] ss:$0 sm:$0xff]  ;;  %v895_v2 = vld [vmem:[#allocation7] ss:$0 sm:$0xff] }
  0x6c   : > { %v247_v3 = vmul.f32 %v893_v1, %v216_v0  ;;  %v219_v6 = vld [vmem:[%s882_s19 + $0x18] sm:$0xff]  ;;  %v248_v7 = vmul.f32 %v893_v1, %v217_v4  ;;  %v249_v8 = vmul.f32 %v893_v1, %v218_v5  ;;  %v220_v10 = vld [vmem:[%s882_s19 + $0x20] sm:$0xff]  ;;  %v221_v11 = vld [vmem:[%s882_s19 + $0x28] sm:$0xff]  ;;  %s340_s30 = sshll.u32 %s923_s23, 4  ;;  %s999_s10 = scalar_lea.hbm %s1049_s3, %s447_s26  ;;  %s990_s30 = int_to_ptr.vmem [resolvable:$true] %s340_s30 }
  0x6d   : > { %v250_v9 = vmul.f32 %v893_v1, %v219_v6  ;;  %v222_v12 = vld [vmem:[%s882_s19 + $0x30] sm:$0xff]  ;;  %v251_v14 = vmul.f32 %v893_v1, %v220_v10  ;;  %v252_v15 = vmul.f32 %v893_v1, %v221_v11  ;;  %v223_v17 = vld [vmem:[%s882_s19 + $0x38] sm:$0xff]  ;;  %v224_v18 = vld [vmem:[%s882_s19 + $0x40] sm:$0xff]  ;;  %s327_s11 = scalar_lea.sflag [#allocation4], %s876_s17  ;;  %s607_s20 = scalar_lea.vmem %s990_s30, 3072 }
  0x6e   : > { %v278_v13 = vadd.f32 %v895_v2, %v247_v3  ;;  %v253_v16 = vmul.f32 %v893_v1, %v222_v12  ;;  %v225_v19 = vld [vmem:[%s882_s19 + $0x48] sm:$0xff]  ;;  %v279_v20 = vadd.f32 %v895_v2, %v248_v7  ;;  %v280_v21 = vadd.f32 %v895_v2, %v249_v8  ;;  %v226_v24 = vld [vmem:[%s882_s19 + $0x50] sm:$0xff]  ;;  %v227_v25 = vld [vmem:[%s882_s19 + $0x58] sm:$0xff]  ;;  %p608_p7 = scmp.ne.s32.totalorder %s990_s30, %s607_s20  ;;  %p1067_p5 = scmp.ne.s32.totalorder %s1057_s24, 0 }
  0x6f   : > { %v281_v22 = vadd.f32 %v895_v2, %v250_v9  ;;  %v254_v23 = vmul.f32 %v893_v1, %v223_v17  ;;  %v228_v26 = vld [vmem:[%s882_s19 + $0x60] sm:$0xff]  ;;  %v282_v27 = vadd.f32 %v895_v2, %v251_v14  ;;  %v283_v28 = vadd.f32 %v895_v2, %v252_v15  ;;  %v229_v31 = vld [vmem:[%s882_s19 + $0x68] sm:$0xff]  ;;  %v230_v32 = vld [vmem:[%s882_s19 + $0x70] sm:$0xff]  ;;  %s684_s22 = smov [#allocation8]  }
  0x70   : > { %302 = vst [vmem:[%s923_s23] sm:$0xff] %v278_v13  ;;  %v284_v29 = vadd.f32 %v895_v2, %v253_v16  ;;  %v255_v30 = vmul.f32 %v893_v1, %v224_v18  ;;  %v231_v33 = vld [vmem:[%s882_s19 + $0x78] sm:$0xff]  ;;  %303 = vst [vmem:[%s923_s23 + $0x8] sm:$0xff] %v279_v20  ;;  %v256_v35 = vmul.f32 %v893_v1, %v225_v19  ;;  %v232_v38 = vld [vmem:[%s882_s19 + $0x80] sm:$0xff]  ;;  %p609_p9 = pnand %p608_p7, %p1067_p5  ;;  %s611_s4 = sshll.u32 %s684_s22, 4  ;;  %s612_s4 = int_to_ptr.vmem [resolvable:$false] %s611_s4 }
  0x71   : > { %304 = vst [vmem:[%s923_s23 + $0x10] sm:$0xff] %v280_v21  ;;  %305 = vst [vmem:[%s923_s23 + $0x18] sm:$0xff] %v281_v22  ;;  %v285_v34 = vadd.f32 %v895_v2, %v254_v23  ;;  %v257_v36 = vmul.f32 %v893_v1, %v226_v24  ;;  %v258_v37 = vmul.f32 %v893_v1, %v227_v25  ;;  %v233_v43 = vld [vmem:[%s882_s19 + $0x88] sm:$0xff]  ;;  %v234_v44 = vld [vmem:[%s882_s19 + $0x90] sm:$0xff]  ;;  %s613_s27 = scalar_lea.vmem %s612_s4, 6144  ;;  %p614_p1 = scmp.lt.s32.totalorder %s990_s30, %s612_s4 }
  0x72   : > { %306 = vst [vmem:[%s923_s23 + $0x20] sm:$0xff] %v282_v27  ;;  %307 = vst [vmem:[%s923_s23 + $0x28] sm:$0xff] %v283_v28  ;;  %v286_v39 = vadd.f32 %v895_v2, %v255_v30  ;;  %v259_v40 = vmul.f32 %v893_v1, %v228_v26  ;;  %v260_v41 = vmul.f32 %v893_v1, %v229_v31  ;;  %v235_v45 = vld [vmem:[%s882_s19 + $0x98] sm:$0xff]  ;;  %v236_v50 = vld [vmem:[%s882_s19 + $0xa0] sm:$0xff]  ;;  %p610_p10 = pneg %p609_p9  ;;  %p615_p2 = scmp.lt.s32.totalorder %s613_s27, %s607_s20 }
  0x73   : > { %308 = vst [vmem:[%s923_s23 + $0x30] sm:$0xff] %v284_v29  ;;  %v261_v42 = vmul.f32 %v893_v1, %v230_v32  ;;  %309 = vst [vmem:[%s923_s23 + $0x38] sm:$0xff] %v285_v34  ;;  %v287_v46 = vadd.f32 %v895_v2, %v256_v35  ;;  %v288_v47 = vadd.f32 %v895_v2, %v257_v36  ;;  %v237_v51 = vld [vmem:[%s882_s19 + $0xa8] sm:$0xff]  ;;  %v238_v52 = vld [vmem:[%s882_s19 + $0xb0] sm:$0xff] }
  0x74   : > { %v289_v48 = vadd.f32 %v895_v2, %v258_v37  ;;  %v262_v49 = vmul.f32 %v893_v1, %v231_v33  ;;  %310 = vst [vmem:[%s923_s23 + $0x40] sm:$0xff] %v286_v39  ;;  %v290_v53 = vadd.f32 %v895_v2, %v259_v40  ;;  %v291_v54 = vadd.f32 %v895_v2, %v260_v41  ;;  %v239_v57 = vld [vmem:[%s882_s19 + $0xb8] sm:$0xff]  ;;  %p616_p8 = por %p615_p2, %p614_p1 }
  0x75   : > { %v292_v55 = vadd.f32 %v895_v2, %v261_v42  ;;  %v263_v56 = vmul.f32 %v893_v1, %v232_v38  ;;  %311 = vst [vmem:[%s923_s23 + $0x48] sm:$0xff] %v287_v46  ;;  %312 = vst [vmem:[%s923_s23 + $0x50] sm:$0xff] %v288_v47  ;;  %v264_v59 = vmul.f32 %v893_v1, %v233_v43 }
  0x76   : > { %313 = vst [vmem:[%s923_s23 + $0x58] sm:$0xff] %v289_v48  ;;  %v293_v58 = vadd.f32 %v895_v2, %v262_v49  ;;  %v265_v60 = vmul.f32 %v893_v1, %v234_v44  ;;  %v266_v61 = vmul.f32 %v893_v1, %v235_v45  ;;  %314 = vst [vmem:[%s923_s23 + $0x60] sm:$0xff] %v290_v53  ;;  %p617_p6 = pnand %p616_p8, %p610_p10 }
  0x77   : > { %315 = vst [vmem:[%s923_s23 + $0x68] sm:$0xff] %v291_v54  ;;  %316 = vst [vmem:[%s923_s23 + $0x70] sm:$0xff] %v292_v55  ;;  %v294_v62 = vadd.f32 %v895_v2, %v263_v56  ;;  %v267_v63 = vmul.f32 %v893_v1, %v236_v50  ;;  %v268_v0 = vmul.f32 %v893_v1, %v237_v51 }
  0x78   : > { %v269_v3 = vmul.f32 %v893_v1, %v238_v52  ;;  %317 = vst [vmem:[%s923_s23 + $0x78] sm:$0xff] %v293_v58  ;;  %v295_v4 = vadd.f32 %v895_v2, %v264_v59  ;;  %v296_v5 = vadd.f32 %v895_v2, %v265_v60  ;;  %v297_v6 = vadd.f32 %v895_v2, %v266_v61 }
  0x79   : > { %v270_v7 = vmul.f32 %v893_v1, %v239_v57  ;;  %318 = vst [vmem:[%s923_s23 + $0x80] sm:$0xff] %v294_v62  ;;  %v298_v8 = vadd.f32 %v895_v2, %v267_v63  ;;  %v299_v9 = vadd.f32 %v895_v2, %v268_v0 }
  0x7a   : > { %v300_v10 = vadd.f32 %v895_v2, %v269_v3  ;;  %319 = vst [vmem:[%s923_s23 + $0x88] sm:$0xff] %v295_v4  ;;  %320 = vst [vmem:[%s923_s23 + $0x90] sm:$0xff] %v296_v5 }
  0x7b   : > { %321 = vst [vmem:[%s923_s23 + $0x98] sm:$0xff] %v297_v6  ;;  %v301_v11 = vadd.f32 %v895_v2, %v270_v7  ;;  %322 = vst [vmem:[%s923_s23 + $0xa0] sm:$0xff] %v298_v8 }
  0x7c   : > { %323 = vst [vmem:[%s923_s23 + $0xa8] sm:$0xff] %v299_v9  ;;  %324 = vst [vmem:[%s923_s23 + $0xb0] sm:$0xff] %v300_v10 }
  0x7d   : > { %325 = vst [vmem:[%s923_s23 + $0xb8] sm:$0xff] %v301_v11 }
  0x7e   : > { %620 = shalt.err (!%p617_p6)
}
  0x7f   : > { %s621_s6 = scalar_lea.hbm %s999_s10, 3072  ;;  %s625_s29 = scalar_lea.hbm %s1049_s3, 9216 }
  0x80   : > { %p622_p12 = scmp.ne.s32.totalorder %s999_s10, %s621_s6  ;;  %p626_p11 = scmp.lt.u32.totalorder %s999_s10, %s1049_s3 }
  0x81   : > { %p627_p0 = scmp.lt.u32.totalorder %s625_s29, %s621_s6  ;;  %p629_p7 = scmp.lt.u32.totalorder %s621_s6, %s999_s10 }
  0x82   : > { %p623_p13 = pnand %p622_p12, %p1067_p5 }
  0x83   : > { %p628_p3 = por %p627_p0, %p626_p11 }
  0x84   : > { %p624_p4 = pneg %p623_p13 }
  0x85   : > { %p630_p9 = por %p629_p7, %p628_p3 }
  0x87   : > { %p631_p10 = pnand %p630_p9, %p624_p4 }
  0x89   : > { %634 = shalt.err (!%p631_p10)
}
  0x8a   : > { %s685_s19 = smov 128   ;;  %s686_s23 = smov 8  }
  0x8b   : > { %460 = dma.vmem_to_hbm [thread:$0]  (%p1067_p5), %s990_s30, 3072, %s999_s10, %s327_s11, %s685_s19, %s685_s19, %s686_s23  }
  0x8c PF: > { %p482_p1 = scmp.ge.s32.totalorder %s677_s15, 2  ;;  %s355_s26 = sand.u32 1, %s665_s12  }
  0x8d   : > { %p1068_p2 = scmp.ne.s32.totalorder %s1058_s25, 0  ;;  %s356_s16 = scalar_lea.sflag [#allocation4], %s355_s26 }
  0x8f   : > { %p474_p8 = pnand %p482_p1, %p1068_p2 }
  0x91   : > { %660 = dma.done.wait (!%p474_p8), %s356_s16, 3072  }
  0x92   : > { %662 = vsyncadd (!%p474_p8), %s356_s16, 4294964224  ;;  %p17_p6 = scmp.ge.s32.totalorder %s732_s18, 5   ;;  %s1069_s12 = smov %s669_s13 }
  0x93   : > { %s1070_s13 = smov %s673_s14  ;;  %s1071_s14 = smov %s744_s21 }
  0x94   : > { %s1072_s15 = smov %s732_s18  ;;  %19 = sbr.rel (!%p17_p6) target bundleno = 6 (0x6), region = 85 }
  0x9b   :  { %361 = vsyncpa [#allocation3], 1 }
  0x9c   :  { %363 = vsyncpa [#allocation3 + $0x1], 1 }
  0x9d   :  { %364 = vsyncpa [#allocation6], 1 }
  0x9e   :  { %365 = vsyncpa [#allocation4], 1 }
  0x9f   :  { %367 = vsyncpa [#allocation4 + $0x1], 1 }

// kernel: convolution_block_forward.6
= control target key start
LH: loop header
LB: loop body
LE: loop exit
PB: predicated region body
PF: predicated region fallthrough
CT: control target
= control target key end

     0   :  { %11 = vsyncpa [#allocation3], 0  ;;  %s2147_s0 = inlined_call_operand.hbm [shape: bf16[576,72], index: 0, kind: input, shape index: {}]   ;;  %s2148_s1 = inlined_call_operand.hbm [shape: bf16[72,128], index: 1, kind: input, shape index: {}]   ;;  %s2149_s2 = inlined_call_operand.hbm [shape: f32[1,128], index: 2, kind: input, shape index: {}]   ;;  %s2150_s3 = inlined_call_operand.hbm [shape: f32[576,128], index: 3, kind: output, shape index: {0}]   ;;  %s2151_s4 = inlined_call_operand.hbm [shape: f32[24,128], index: 4, kind: output, shape index: {1}]   ;;  %s2152_s5 = inlined_call_operand.hbm [shape: f32[24,128], index: 5, kind: output, shape index: {2}]  }
   0x1   :  { %13 = vsyncpa [#allocation3 + $0x1], 0 }
   0x2   :  { %14 = vsyncpa [#allocation6], 0 }
   0x3   :  { %15 = vsyncpa [#allocation4], 0 }
   0x4   :  { %17 = vsyncpa [#allocation4 + $0x1], 0 }
   0x5   :  { %18 = vsyncpa [#allocation10], 0 }
   0x6   :  { %20 = vsyncpa [#allocation10 + $0x1], 0  ;;  %s1542_s18 = smov 0   ;;  %s1544_s19 = smov 0  }
   0x7   :  { %s1546_s20 = smov 0   ;;  %s1548_s21 = smov 0  }
   0x8 LB: > { %s1563_s22 = sadd.s32 4294967295, %s1500_s21   ;;  %s2156_s23 = sadd.s32 4294967294, %s1500_s21   ;;  %s1500_s21 = sphi %s1548_s21, %s2175_s21   ;;  %s1496_s20 = sphi %s1546_s20, %s2174_s20   ;;  %s1492_s19 = sphi %s1544_s19, %s2173_s19   ;;  %s1488_s18 = sphi %s1542_s18, %s2172_s18  }
   0x9   : > { %p46_p0 = scmp.ne.s32.totalorder %s1492_s19, %s1488_s18  ;;  %p2153_p1 = scmp.eq.s32.totalorder %s1563_s22, 0 }
   0xa   : > { %p118_p3 = scmp.eq.s32.totalorder %s2156_s23, 2  ;;  %p1071_p5 = scmp.ge.s32.totalorder %s1500_s21, 1 }
   0xb   : > { %p1574_p4 = por %p2153_p1, %p46_p0  ;;  %p177_p7 = scmp.lt.s32.totalorder %s1500_s21, 4 }
   0xc   : > { %p1579_p6 = por %p118_p3, %p46_p0  ;;  %s1502_s27 = smov [#allocation5]  }
   0xd   : > { %s2158_s24 = scalar_select %p1574_p4, 1, 0 }
   0xe   : > { %s2159_s25 = scalar_select %p1579_p6, 1, 0 }
   0xf   : > { %p1584_p8 = pnand %p1071_p5, %p177_p7  ;;  %s189_s28 = sshll.u32 %s1502_s27, 4  ;;  %s190_s28 = int_to_ptr.vmem [resolvable:$true] %s189_s28 }
  0x10   : > { %s1503_s30 = smov [#allocation7]   ;;  %s1284_s9 = scalar_lea.hbm %s2148_s1, 576 }
  0x11   : > { %s2160_s26 = scalar_select %p1584_p8, 1, 0 }
  0x12   : > { %p1202_p9 = pneg %p1584_p8  ;;  %s203_s6 = sshll.u32 %s1503_s30, 4  ;;  %s1596_s6 = int_to_ptr.vmem [resolvable:$true] %s203_s6 }
  0x13   : > { %p1285_p11 = scmp.ne.s32.totalorder %s2148_s1, %s1284_s9  ;;  %p1291_p3 = scmp.lt.u32.totalorder %s1284_s9, %s2148_s1 }
  0x14   : > { %p1592_p10 = pnand %p1202_p9, %p2153_p1 }
  0x16   : > { %p1286_p12 = pneg %p1592_p10 }
  0x18   : > { %p1287_p13 = pnand %p1286_p12, %p1285_p11 }
  0x1a   : > { %p1288_p0 = pneg %p1287_p13 }
  0x1c   : > { %p1293_p5 = pnand %p1291_p3, %p1288_p0 }
  0x1e   : > { %1296 = shalt.err (!%p1293_p5)
}
  0x1f   : > { %s1297_s14 = scalar_lea.vmem %s190_s28, 576  ;;  %p1305_p2 = scmp.lt.s32.totalorder %s190_s28, %s190_s28 }
  0x20   : > { %p1298_p7 = scmp.ne.s32.totalorder %s190_s28, %s1297_s14  ;;  %p1306_p6 = scmp.lt.s32.totalorder %s1297_s14, %s1297_s14 }
  0x22   : > { %p1300_p9 = pnand %p1298_p7, %p1286_p12  ;;  %p1307_p4 = por %p1306_p6, %p1305_p2 }
  0x24   : > { %p1301_p1 = pneg %p1300_p9 }
  0x26   : > { %p1308_p8 = pnand %p1307_p4, %p1301_p1 }
  0x28   : > { %1311 = shalt.err (!%p1308_p8)
}
  0x29   : > { %s2157_s15 = smov 64   ;;  %s1505_s16 = smov 4  }
  0x2a   : > { %1205 = dma.hbm_to_vmem [thread:$0]  (!%p1592_p10), %s2148_s1, 576, %s190_s28, [#allocation6], %s2157_s15, %s2157_s15, %s1505_s16  }
  0x2b   : > { %s1312_s8 = scalar_lea.hbm %s2149_s2, 16 }
  0x2c   : > { %p1313_p1 = scmp.ne.s32.totalorder %s2149_s2, %s1312_s8  ;;  %p1319_p6 = scmp.lt.u32.totalorder %s1312_s8, %s2149_s2 }
  0x2e   : > { %p1315_p2 = pnand %p1313_p1, %p1286_p12 }
  0x30   : > { %p1316_p4 = pneg %p1315_p2 }
  0x32   : > { %p1321_p8 = pnand %p1319_p6, %p1316_p4 }
  0x34   : > { %1324 = shalt.err (!%p1321_p8)
}
  0x35   : > { %s1325_s28 = scalar_lea.vmem %s1596_s6, 16  ;;  %s1332_s13 = scalar_lea.vmem %s1596_s6, 32 }
  0x36   : > { %p1326_p11 = scmp.ne.s32.totalorder %s1596_s6, %s1325_s28  ;;  %p1333_p3 = scmp.lt.s32.totalorder %s1596_s6, %s1596_s6 }
  0x37   : > { %p1334_p5 = scmp.lt.s32.totalorder %s1332_s13, %s1325_s28 }
  0x38   : > { %p1328_p13 = pnand %p1326_p11, %p1286_p12 }
  0x39   : > { %p1335_p7 = por %p1334_p5, %p1333_p3 }
  0x3a   : > { %p1329_p0 = pneg %p1328_p13 }
  0x3c   : > { %p1336_p9 = pnand %p1335_p7, %p1329_p0 }
  0x3e   : > { %1339 = shalt.err (!%p1336_p9)
}
  0x3f   : > { %1208 = dma.hbm_to_vmem [thread:$0]  (!%p1592_p10), %s2149_s2, 16, %s1596_s6, [#allocation6]  }
  0x40   : > { %s1650_s27 = sadd.s32 1, %s1500_s21   ;;  %s33_s29 = sadd.s32 1, %s1496_s20 }
  0x41   : > { %s30_s30 = ssub.s32 %s1500_s21, %s1650_s27  ;;  %p40_p12 = scmp.ne.s32.totalorder %s1496_s20, %s1492_s19 }
  0x42   : > { %p31_p1 = scmp.eq.s32.totalorder %s30_s30, 0  ;;  %p41_p2 = scmp.eq.s32.totalorder %s1500_s21, 0 }
  0x43   : > { %p2162_p4 = scmp.eq.s32.totalorder %s1563_s22, 2  ;;  %p1225_p8 = scmp.lt.s32.totalorder %s1500_s21, 3 }
  0x44   : > { %s1666_s8 = scalar_select %p31_p1, %s1496_s20, %s33_s29  }
  0x45   : > { %p1660_p6 = por %p2162_p4, %p40_p12  ;;  %p42_p11 = por %p41_p2, %p40_p12 }
  0x46   : > { %s214_s9 = sand.u32 1, %s1496_s20   ;;  %s1118_s6 = smul.u32 1536, %s1500_s21 }
  0x47   : > { %s1183_s10 = smul.u32 96, %s214_s9  ;;  %p1670_p10 = pnand %p1225_p8, %p42_p11 }
  0x48   : > { %s1677_s13 = scalar_lea.hbm %s2147_s0, %s1118_s6  ;;  %s1681_s29 = scalar_lea.sflag [#allocation3], %s214_s9 }
  0x49   : > { %s218_s14 = scalar_lea.vmem [#allocation2], %s1183_s10  ;;  %s1340_s30 = scalar_lea.hbm %s1677_s13, 1536 }
  0x4a   : > { %s225_s17 = sshll.u32 %s218_s14, 4  ;;  %p1341_p13 = scmp.ne.s32.totalorder %s1677_s13, %s1340_s30  ;;  %s1679_s17 = int_to_ptr.vmem [resolvable:$true] %s225_s17 }
  0x4b   : > { %p1342_p0 = pneg %p1670_p10  ;;  %s1345_s28 = scalar_lea.hbm %s2147_s0, 4608 }
  0x4c   : > { %p1346_p7 = scmp.lt.u32.totalorder %s1677_s13, %s2147_s0  ;;  %p1347_p9 = scmp.lt.u32.totalorder %s1345_s28, %s1340_s30 }
  0x4d   : > { %p1343_p3 = pnand %p1342_p0, %p1341_p13  ;;  %p1349_p1 = scmp.lt.u32.totalorder %s1340_s30, %s1677_s13 }
  0x4e   : > { %p1348_p12 = por %p1347_p9, %p1346_p7 }
  0x4f   : > { %p1344_p5 = pneg %p1343_p3 }
  0x50   : > { %p1350_p2 = por %p1349_p1, %p1348_p12 }
  0x52   : > { %p1351_p4 = pnand %p1350_p2, %p1344_p5 }
  0x54   : > { %1354 = shalt.err (!%p1351_p4)
}
  0x55   : > { %s1355_s9 = scalar_lea.vmem %s1679_s17, 1536  ;;  %s1506_s10 = smov [#allocation2]  }
  0x56   : > { %p1356_p8 = scmp.ne.s32.totalorder %s1679_s17, %s1355_s9  ;;  %s1360_s14 = sshll.u32 %s1506_s10, 4  ;;  %s1361_s14 = int_to_ptr.vmem [resolvable:$false] %s1360_s14 }
  0x57   : > { %s1362_s23 = scalar_lea.vmem %s1361_s14, 3072  ;;  %p1363_p3 = scmp.lt.s32.totalorder %s1679_s17, %s1361_s14 }
  0x58   : > { %p1358_p11 = pnand %p1356_p8, %p1342_p0  ;;  %p1364_p7 = scmp.lt.s32.totalorder %s1362_s23, %s1355_s9 }
  0x5a   : > { %p1359_p13 = pneg %p1358_p11  ;;  %p1365_p9 = por %p1364_p7, %p1363_p3 }
  0x5c   : > { %p1366_p12 = pnand %p1365_p9, %p1359_p13 }
  0x5e   : > { %1369 = shalt.err (!%p1366_p12)
}
  0x5f   : > { %s2165_s15 = smov 64   ;;  %p2166_p0 = scmp.ne.s32.totalorder %s2160_s26, 0 }
  0x60   : > { %1212 = dma.hbm_to_vmem [thread:$0]  (!%p1670_p10), %s1677_s13, 1536, %s1679_s17, %s1681_s29, %s2165_s15, %s2165_s15, %s1505_s16  }
  0x61   : > { %237 = sbr.rel (%p2166_p0) target bundleno = 455 (0x1c7), region = 32  ;;  %s1715_s30 = sand.u32 (!%p2166_p0), 1, %s1492_s19  }
  0x62   : > { %s1184_s6 = smul.u32 (!%p2166_p0), 96, %s1715_s30  ;;  %s240_s12 = scalar_lea.sflag (!%p2166_p0), [#allocation3], %s1715_s30 }
  0x63   : > { %p2167_p5 = scmp.ne.s32.totalorder (!%p2166_p0), %s2158_s24, 0 }
  0x64   : > { %s1719_s28 = scalar_lea.vmem (!%p2166_p0), [#allocation2], %s1184_s6 }
  0x68   : > { %1471 = dma.done.wait (%p2167_p5), %s240_s12, 1536  }
  0x69   : > { %1473 = vsyncadd (%p2167_p5), %s240_s12, 4294965760  ;;  %p2168_p10 = scmp.eq.s32.totalorder %s1563_s22, 0 }
  0x6b   : > { %1475 = dma.done.wait (%p2168_p10), [#allocation6], 592   ;;  %p2169_p1 = pmov %p2168_p10 }
  0x6c   : > { %v1267_v0 = vld [vmem:[#allocation5] sm:$0xff]   ;;  %v1268_v1 = vld [vmem:[#allocation5 + $0x8] sm:$0xff]   ;;  %v1269_v2 = vld [vmem:[#allocation5 + $0x10] sm:$0xff]   ;;  %vm418_vm0 = vcmask 588800   ;;  %vm455_vm1 = vcmask 1043456   ;;  %v637_v18 = vlaneseq  ;;  %s636_s24 = smul.u32 192, %s1563_s22 }
  0x6d   : > { %1477 = vsyncadd (%p2169_p1), [#allocation6], 4294966704  ;;  %1137 = vmatprep.subr.bf16.mxu0 %v1267_v0  ;;  %1171 = vmatprep.subr.bf16.mxu1 %v1267_v0  ;;  %v1272_v3 = vld [vmem:[%s1719_s28] sm:$0xff]   ;;  %v1270_v4 = vld [vmem:[#allocation5 + $0x18] sm:$0xff]   ;;  %s1185_s26 = smul.u32 192, %s1715_s30  ;;  %s868_s10 = scalar_lea.sflag [#allocation4], %s1715_s30 }
  0x6e   : > { %1138 = vmatpush3.bf16.msra.mxu0 %v1267_v0  ;;  %1176 = vmatpush3.bf16.msra.mxu1 %v1267_v0  ;;  %v1278_v5 = vld [vmem:[%s1719_s28 + $0x30] sm:$0xff]   ;;  %v1271_v6 = vld [vmem:[#allocation5 + $0x20] ss:$0 sps:$4 sm:$0xff]   ;;  %v1273_v8 = vld [vmem:[%s1719_s28 + $0x8] sm:$0xff]   ;;  %v1753_v19 = vshrl.u32 %v637_v18, 7  ;;  %v1757_v21 = vstv %s636_s24  ;;  %s1119_s11 = smul.u32 3072, %s1563_s22 }
  0x6f   : > { %1139 = vmatprep.subr.bf16.mxu0 %v1268_v1  ;;  %1172 = vmatprep.subr.bf16.mxu1 %v1268_v1  ;;  %v457_v7 = vsel %vm455_vm1, %v1271_v6, 0  ;;  %v1274_v9 = vld [vmem:[%s1719_s28 + $0x10] sm:$0xff]   ;;  %v1279_v10 = vld [vmem:[%s1719_s28 + $0x38] sm:$0xff]   ;;  %v1280_v11 = vld [vmem:[%s1719_s28 + $0x40] sm:$0xff]   ;;  %s1817_s16 = scalar_lea.vmem [#allocation8], %s1185_s26  ;;  %s1507_s23 = smov [#allocation8]  }
  0x70   : > { %1147 = vmatprep.mubr.msk.bf16.mxu0 %vm418_vm0, %v1272_v3  ;;  %1159 = vmatprep.mubr.msk.bf16.mxu1 %vm418_vm0, %v1278_v5  ;;  %v1275_v12 = vld [vmem:[%s1719_s28 + $0x18] sm:$0xff]   ;;  %v1276_v13 = vld [vmem:[%s1719_s28 + $0x20] sm:$0xff]   ;;  %v1281_v14 = vld [vmem:[%s1719_s28 + $0x48] sm:$0xff]   ;;  %v640_v20 = vadd.s32 16, %v1753_v19  ;;  %v641_v22 = vadd.s32 24, %v1753_v19  ;;  %v639_v23 = vadd.s32 8, %v1753_v19  ;;  %v663_v25 = vadd.s32 %v1757_v21, %v1753_v19  ;;  %s1994_s9 = scalar_lea.hbm %s2150_s3, %s1119_s11 }
  0x71   : > { %v1282_v15 = vld [vmem:[%s1719_s28 + $0x50] sm:$0xff]   ;;  %v1277_v16 = vld [vmem:[%s1719_s28 + $0x28] sm:$0xff]   ;;  %v1283_v17 = vld [vmem:[%s1719_s28 + $0x58] sm:$0xff]   ;;  %v642_v26 = vadd.s32 32, %v1753_v19  ;;  %v644_v29 = vadd.s32 48, %v1753_v19  ;;  %v645_v30 = vadd.s32 56, %v1753_v19 }
  0x72   : > { %1140 = vmatpush3.bf16.msra.mxu0 %v1268_v1  ;;  %1177 = vmatpush3.bf16.msra.mxu1 %v1268_v1  ;;  %v665_v24 = vadd.s32 %v1757_v21, %v640_v20  ;;  %v1766_v27 = vadd.s32 %v1757_v21, %v641_v22  ;;  %v1769_v28 = vadd.s32 %v1757_v21, %v639_v23  ;;  %v643_v31 = vadd.s32 40, %v1753_v19  ;;  %v1776_v33 = vld [vmem:[#allocation7] ss:$0 sm:$0xff]  ;;  %s891_s13 = sshll.u32 %s1817_s16, 4  ;;  %s1374_s15 = sshll.u32 %s1507_s23, 4  ;;  %s1976_s13 = int_to_ptr.vmem [resolvable:$true] %s891_s13  ;;  %s1375_s15 = int_to_ptr.vmem [resolvable:$false] %s1374_s15 }
  0x73   : > { %1141 = vmatprep.subr.bf16.mxu0 %v1269_v2  ;;  %1173 = vmatprep.subr.bf16.mxu1 %v1269_v2  ;;  %v648_v32 = vadd.s32 80, %v1753_v19  ;;  %vm687_vm3 = vcmp.lt.s32.totalorder %v663_v25, 512  ;;  %v1779_v34 = vadd.s32 %v1757_v21, %v642_v26  ;;  %v1784_v36 = vadd.s32 %v1757_v21, %v644_v29  ;;  %s1370_s14 = scalar_lea.vmem %s1976_s13, 3072  ;;  %s1376_s6 = scalar_lea.vmem %s1375_s15, 6144 }
  0x74   : > { %vm689_vm2 = vcmp.lt.s32.totalorder %v665_v24, 512  ;;  %vm690_vm4 = vcmp.lt.s32.totalorder %v1766_v27, 512  ;;  %vm688_vm5 = vcmp.lt.s32.totalorder %v1769_v28, 512  ;;  %v1787_v37 = vadd.s32 %v1757_v21, %v645_v30  ;;  %p1371_p2 = scmp.ne.s32.totalorder %s1976_s13, %s1370_s14  ;;  %p1377_p11 = scmp.lt.s32.totalorder %s1976_s13, %s1375_s15 }
  0x75   : > { %v1791_v40 = vadd.s32 %v1757_v21, %v643_v31  ;;  %v1794_v41 = vadd.s32 %v1757_v21, %v648_v32  ;;  %v646_v42 = vadd.s32 64, %v1753_v19  ;;  %v649_v46 = vadd.s32 88, %v1753_v19  ;;  %p1378_p13 = scmp.lt.s32.totalorder %s1376_s6, %s1370_s14 }
  0x76   : > { %1142 = vmatpush3.bf16.msra.mxu0 %v1269_v2  ;;  %1178 = vmatpush3.bf16.msra.mxu1 %v1269_v2  ;;  %v647_v47 = vadd.s32 72, %v1753_v19  ;;  %vm691_vm6 = vcmp.lt.s32.totalorder %v1779_v34, 512  ;;  %v652_v53 = vadd.s32 112, %v1753_v19  ;;  %vm693_vm7 = vcmp.lt.s32.totalorder %v1784_v36, 512  ;;  %p1372_p4 = pnand %p1371_p2, %p1660_p6 }
  0x77   : > { %1143 = vmatprep.subr.bf16.mxu0 %v1270_v4  ;;  %1174 = vmatprep.subr.bf16.mxu1 %v1270_v4  ;;  %vm692_vm8 = vcmp.lt.s32.totalorder %v1791_v40, 512  ;;  %v1822_v62 = vadd.s32 %v1757_v21, %v646_v42  ;;  %v1831_v3 = vadd.s32 %v1757_v21, %v649_v46  ;;  %vm694_vm9 = vcmp.lt.s32.totalorder %v1787_v37, 512  ;;  %p1379_p3 = por %p1378_p13, %p1377_p11 }
  0x78   : > { %vm697_vm11 = vcmp.lt.s32.totalorder %v1794_v41, 512  ;;  %v654_v36 = vadd.s32 128, %v1753_v19  ;;  %p1373_p8 = pneg %p1372_p4 }
  0x79   : > { %vm695_vm10 = vcmp.lt.s32.totalorder %v1822_v62, 512  ;;  %vm698_vm14 = vcmp.lt.s32.totalorder %v1831_v3, 512 }
  0x7a   : > { %1144 = vmatpush3.bf16.msra.mxu0 %v1270_v4  ;;  %1179 = vmatpush3.bf16.msra.mxu1 %v1270_v4  ;;  %v650_v4 = vadd.s32 96, %v1753_v19  ;;  %p1380_p7 = pnand %p1379_p3, %p1373_p8 }
  0x7b   : > { %1181 = vmatprep.subr.msk.bf16.mxu0 %vm455_vm1, %v1271_v6  ;;  %1182 = vmatprep.subr.msk.bf16.mxu1 %vm455_vm1, %v1271_v6  ;;  %v1841_v6 = vadd.s32 %v1757_v21, %v647_v47 }
  0x7c   : > { %v1861_v26 = vadd.s32 %v1757_v21, %v650_v4 }
  0x7d   : > { %vm696_vm12 = vcmp.lt.s32.totalorder %v1841_v6, 512 }
  0x7e   : > { %1146 = vmatpush3.bf16.msra.mxu0 %v457_v7  ;;  %1180 = vmatpush3.bf16.msra.mxu1 %v457_v7  ;;  %v653_v7 = vadd.s32 120, %v1753_v19  ;;  %vm699_vm13 = vcmp.lt.s32.totalorder %v1861_v26, 512 }
  0x80   : > { %v1873_v42 = vadd.s32 %v1757_v21, %v653_v7 }
  0x81   : > { %1148 = vmatmul.mubr.msk.bf16.vlgmr.msra.gmra.mrb[0].mxu0 %vm418_vm0, %v1273_v8  ;;  %1160 = vmatmul.mubr.msk.bf16.vlgmr.msra.gmra.mrb[0].mxu1 %vm418_vm0, %v1279_v10  ;;  %v651_v8 = vadd.s32 104, %v1753_v19 }
  0x82   : > { %1151 = vmatprep.mubr.msk.bf16.mxu0 %vm418_vm0, %v1274_v9  ;;  %1163 = vmatprep.mubr.msk.bf16.mxu1 %vm418_vm0, %v1280_v11  ;;  %vm702_vm1 = vcmp.lt.s32.totalorder %v1873_v42, 512 }
  0x89   : > { %1152 = vmatmul.mubr.msk.bf16.gmra.mrb[4].mxu0 %vm418_vm0, %v1275_v12  ;;  %1164 = vmatmul.mubr.msk.bf16.gmra.mrb[4].mxu1 %vm418_vm0, %v1281_v14  ;;  %v1852_v12 = vadd.s32 %v1757_v21, %v652_v53 }
  0x8a   : > { %1155 = vmatprep.mubr.msk.bf16.mxu0 %vm418_vm0, %v1276_v13  ;;  %1167 = vmatprep.mubr.msk.bf16.mxu1 %vm418_vm0, %v1282_v15 }
  0x91   : > { %1156 = vmatmul.mubr.msk.bf16.gmra.mrb[8].mxu0 %vm418_vm0, %v1277_v16  ;;  %1168 = vmatmul.mubr.msk.bf16.gmra.mrb[8].mxu1 %vm418_vm0, %v1283_v17  ;;  %vm701_vm0 = vcmp.lt.s32.totalorder %v1852_v12, 512 }
 0x154   : > { %v1149_v35 = vpop.f32.mrb[0].mxu0  ;;  %v1161_v43 = vpop.f32.mrb[0].mxu1 }
 0x155   : > { %v502_v38 = vadd.f32 %v1149_v35, %v1776_v33  ;;  %v493_v39 = vpop.f32.mrb[1].mxu0  ;;  %v1801_v48 = vadd.f32 %v1161_v43, %v1776_v33  ;;  %v541_v49 = vpop.f32.mrb[1].mxu1 }
 0x156   : > { %v494_v44 = vadd.f32 %v1776_v33, %v493_v39  ;;  %v1150_v45 = vpop.f32.mrb[2].mxu0  ;;  %v1807_v54 = vadd.f32 %v1776_v33, %v541_v49  ;;  %v1162_v55 = vpop.f32.mrb[2].mxu1 }
 0x157   : > { %v590_v50 = vmax.f32 %v502_v38, 0.0  ;;  %v505_v51 = vadd.f32 %v1150_v45, %v1776_v33  ;;  %v496_v52 = vpop.f32.mrb[3].mxu0  ;;  %v602_v58 = vmax.f32 %v1801_v48, 0.0  ;;  %v1813_v59 = vadd.f32 %v1162_v55, %v1776_v33  ;;  %v544_v60 = vpop.f32.mrb[3].mxu1 }
 0x158   : > { %v588_v56 = vmax.f32 %v494_v44, 0.0  ;;  %v497_v57 = vadd.f32 %v1776_v33, %v496_v52  ;;  %v600_v63 = vmax.f32 %v1807_v54, 0.0  ;;  %v1826_v0 = vadd.f32 %v1776_v33, %v544_v60 }
 0x159   : > { %614 = vst [vmem:[%s1817_s16 + $0x10] sm:$0xff] %v590_v50  ;;  %v591_v61 = vmax.f32 %v505_v51, 0.0  ;;  %626 = vst [vmem:[%s1817_s16 + $0x70] sm:$0xff] %v602_v58  ;;  %v761_v5 = vsel %vm689_vm2, %v590_v50, 0.0  ;;  %v603_v13 = vmax.f32 %v1813_v59, 0.0  ;;  %v1888_v52 = vadd.s32 %v1757_v21, %v651_v8 }
 0x15a   : > { %612 = vst [vmem:[%s1817_s16] sm:$0xff] %v588_v56  ;;  %v759_v1 = vsel %vm687_vm3, %v588_v56, 0.0  ;;  %v589_v2 = vmax.f32 %v497_v57, 0.0  ;;  %624 = vst [vmem:[%s1817_s16 + $0x60] sm:$0xff] %v600_v63  ;;  %v601_v18 = vmax.f32 %v1826_v0, 0.0  ;;  %v815_v22 = vmul.f32 %v761_v5, %v761_v5 }
 0x15b   : > { %615 = vst [vmem:[%s1817_s16 + $0x18] sm:$0xff] %v591_v61  ;;  %v813_v9 = vmul.f32 %v759_v1, %v759_v1  ;;  %v762_v23 = vsel %vm690_vm4, %v591_v61, 0.0  ;;  %627 = vst [vmem:[%s1817_s16 + $0x78] sm:$0xff] %v603_v13  ;;  %vm700_vm15 = vcmp.lt.s32.totalorder %v1888_v52, 512  ;;  %v658_v52 = vadd.s32 160, %v1753_v19 }
 0x15c   : > { %613 = vst [vmem:[%s1817_s16 + $0x8] sm:$0xff] %v589_v2  ;;  %v760_v10 = vsel %vm688_vm5, %v589_v2, 0.0  ;;  %v1153_v11 = vpop.f32.mrb[4].mxu0  ;;  %v1165_v20 = vpop.f32.mrb[4].mxu1  ;;  %625 = vst [vmem:[%s1817_s16 + $0x68] sm:$0xff] %v601_v18  ;;  %v816_v45 = vmul.f32 %v762_v23, %v762_v23 }
 0x15d   : > { %v783_v14 = vadd.f32 %v760_v10, %v759_v1  ;;  %v814_v15 = vmul.f32 %v760_v10, %v760_v10  ;;  %v518_v16 = vadd.f32 %v1153_v11, %v1776_v33  ;;  %v509_v17 = vpop.f32.mrb[5].mxu0  ;;  %v557_v28 = vpop.f32.mrb[5].mxu1  ;;  %v1876_v43 = vadd.f32 %v1165_v20, %v1776_v33 }
 0x15e   : > { %v510_v24 = vadd.f32 %v1776_v33, %v509_v17  ;;  %v1154_v25 = vpop.f32.mrb[6].mxu0  ;;  %v1166_v27 = vpop.f32.mrb[6].mxu1  ;;  %v1899_v1 = vadd.f32 %v1776_v33, %v557_v28 }
 0x15f   : > { %v784_v29 = vadd.f32 %v783_v14, %v761_v5  ;;  %v837_v30 = vadd.f32 %v814_v15, %v813_v9  ;;  %v594_v31 = vmax.f32 %v518_v16, 0.0  ;;  %v521_v32 = vadd.f32 %v1154_v25, %v1776_v33  ;;  %v512_v35 = vpop.f32.mrb[7].mxu0  ;;  %v1878_v44 = vpop.f32.mrb[7].mxu1 }
 0x160   : > { %v592_v38 = vmax.f32 %v510_v24, 0.0  ;;  %v513_v39 = vadd.f32 %v1776_v33, %v512_v35  ;;  %v606_v61 = vmax.f32 %v1876_v43, 0.0  ;;  %v604_v15 = vmax.f32 %v1899_v1, 0.0 }
 0x161   : > { %v838_v46 = vadd.f32 %v837_v30, %v815_v22  ;;  %618 = vst [vmem:[%s1817_s16 + $0x30] sm:$0xff] %v594_v31  ;;  %v785_v47 = vadd.f32 %v784_v29, %v762_v23  ;;  %v595_v49 = vmax.f32 %v521_v32, 0.0  ;;  %v765_v53 = vsel %vm693_vm7, %v594_v31, 0.0 }
 0x162   : > { %616 = vst [vmem:[%s1817_s16 + $0x20] sm:$0xff] %v592_v38  ;;  %v763_v50 = vsel %vm691_vm6, %v592_v38, 0.0  ;;  %v593_v51 = vmax.f32 %v513_v39, 0.0  ;;  %v819_v10 = vmul.f32 %v765_v53, %v765_v53  ;;  %630 = vst [vmem:[%s1817_s16 + $0x90] sm:$0xff] %v606_v61  ;;  %v1914_v29 = vadd.s32 144, %v1753_v19 }
 0x163   : > { %v786_v55 = vadd.f32 %v785_v47, %v763_v50  ;;  %v817_v56 = vmul.f32 %v763_v50, %v763_v50  ;;  %v839_v57 = vadd.f32 %v838_v46, %v816_v45  ;;  %619 = vst [vmem:[%s1817_s16 + $0x38] sm:$0xff] %v595_v49  ;;  %v766_v40 = vsel %vm694_vm9, %v595_v49, 0.0  ;;  %628 = vst [vmem:[%s1817_s16 + $0x80] sm:$0xff] %v604_v15 }
 0x164   : > { %617 = vst [vmem:[%s1817_s16 + $0x28] sm:$0xff] %v593_v51  ;;  %v764_v34 = vsel %vm692_vm8, %v593_v51, 0.0  ;;  %v1157_v60 = vpop.f32.mrb[8].mxu0  ;;  %v1169_v9 = vpop.f32.mrb[8].mxu1  ;;  %v1920_v30 = vadd.f32 %v1166_v27, %v1776_v33  ;;  %v820_v32 = vmul.f32 %v766_v40, %v766_v40  ;;  %v1928_v47 = vadd.s32 %v1757_v21, %v654_v36 }
 0x165   : > { %v840_v2 = vadd.f32 %v839_v57, %v817_v56  ;;  %v787_v4 = vadd.f32 %v786_v55, %v764_v34  ;;  %v818_v5 = vmul.f32 %v764_v34, %v764_v34  ;;  %v534_v7 = vadd.f32 %v1157_v60, %v1776_v33  ;;  %v525_v8 = vpop.f32.mrb[9].mxu0  ;;  %v573_v16 = vpop.f32.mrb[9].mxu1 }
 0x166   : > { %v526_v11 = vadd.f32 %v1776_v33, %v525_v8  ;;  %v1158_v14 = vpop.f32.mrb[10].mxu0  ;;  %v1170_v37 = vpop.f32.mrb[10].mxu1  ;;  %v655_v27 = vadd.s32 136, %v1753_v19  ;;  %v607_v56 = vmax.f32 %v1920_v30, 0.0  ;;  %v1944_v57 = vadd.f32 %v1776_v33, %v1878_v44 }
 0x167   : > { %v788_v17 = vadd.f32 %v787_v4, %v765_v53  ;;  %v841_v20 = vadd.f32 %v840_v2, %v818_v5  ;;  %v598_v22 = vmax.f32 %v534_v7, 0.0  ;;  %v537_v23 = vadd.f32 %v1158_v14, %v1776_v33  ;;  %v528_v24 = vpop.f32.mrb[11].mxu0  ;;  %v576_v31 = vpop.f32.mrb[11].mxu1 }
 0x168   : > { %v596_v25 = vmax.f32 %v526_v11, 0.0  ;;  %v529_v28 = vadd.f32 %v1776_v33, %v528_v24  ;;  %v771_v53 = vsel %vm699_vm13, %v600_v63, 0.0  ;;  %v1947_v63 = vadd.f32 %v1169_v9, %v1776_v33  ;;  %631 = vst [vmem:[%s1817_s16 + $0x98] sm:$0xff] %v607_v56 }
 0x169   : > { %v842_v35 = vadd.f32 %v841_v20, %v819_v10  ;;  %622 = vst [vmem:[%s1817_s16 + $0x50] sm:$0xff] %v598_v22  ;;  %v789_v38 = vadd.f32 %v788_v17, %v766_v40  ;;  %v599_v39 = vmax.f32 %v537_v23, 0.0  ;;  %v769_v62 = vsel %vm697_vm11, %v598_v22, 0.0 }
 0x16a   : > { %620 = vst [vmem:[%s1817_s16 + $0x40] sm:$0xff] %v596_v25  ;;  %v767_v45 = vsel %vm695_vm10, %v596_v25, 0.0  ;;  %v597_v46 = vmax.f32 %v529_v28, 0.0  ;;  %v605_v6 = vmax.f32 %v1944_v57, 0.0  ;;  %v1956_v60 = vadd.f32 %v1776_v33, %v573_v16 }
 0x16b   : > { %v790_v49 = vadd.f32 %v789_v38, %v767_v45  ;;  %v821_v50 = vmul.f32 %v767_v45, %v767_v45  ;;  %v843_v51 = vadd.f32 %v842_v35, %v820_v32  ;;  %623 = vst [vmem:[%s1817_s16 + $0x58] sm:$0xff] %v599_v39  ;;  %v770_v41 = vsel %vm698_vm14, %v599_v39, 0.0 }
 0x16c   : > { %621 = vst [vmem:[%s1817_s16 + $0x48] sm:$0xff] %v597_v46  ;;  %v768_v55 = vsel %vm696_vm12, %v597_v46, 0.0  ;;  %v1959_v44 = vadd.f32 %v1170_v37, %v1776_v33  ;;  %v823_v36 = vmul.f32 %v769_v62, %v769_v62  ;;  %v610_v3 = vmax.f32 %v1947_v63, 0.0  ;;  %629 = vst [vmem:[%s1817_s16 + $0x88] sm:$0xff] %v605_v6 }
 0x16d   : > { %v844_v34 = vadd.f32 %v843_v51, %v821_v50  ;;  %v791_v54 = vadd.f32 %v790_v49, %v768_v55  ;;  %v822_v26 = vmul.f32 %v768_v55, %v768_v55  ;;  %v657_v5 = vadd.s32 152, %v1753_v19 }
 0x16e   : > { %v608_v7 = vmax.f32 %v1956_v60, 0.0  ;;  %v611_v8 = vmax.f32 %v1959_v44, 0.0  ;;  %v1971_v9 = vadd.f32 %v1776_v33, %v576_v31  ;;  %v824_v10 = vmul.f32 %v770_v41, %v770_v41  ;;  %634 = vst [vmem:[%s1817_s16 + $0xb0] sm:$0xff] %v610_v3 }
 0x16f   : > { %v792_v2 = vadd.f32 %v791_v54, %v769_v62  ;;  %v845_v4 = vadd.f32 %v844_v34, %v822_v26  ;;  %v825_v14 = vmul.f32 %v771_v53, %v771_v53  ;;  %v772_v16 = vsel %vm700_vm15, %v601_v18, 0.0 }
 0x170   : > { %v680_v33 = vadd.s32 %v1757_v21, %v655_v27  ;;  %632 = vst [vmem:[%s1817_s16 + $0xa0] sm:$0xff] %v608_v7  ;;  %635 = vst [vmem:[%s1817_s16 + $0xb8] sm:$0xff] %v611_v8  ;;  %v609_v17 = vmax.f32 %v1971_v9, 0.0  ;;  %vm703_vm2 = vcmp.lt.s32.totalorder %v1928_v47, 512  ;;  %v773_v20 = vsel %vm701_vm0, %v602_v58, 0.0 }
 0x171   : > { %v846_v40 = vadd.f32 %v845_v4, %v823_v36  ;;  %v793_v11 = vadd.f32 %v792_v2, %v770_v41  ;;  %v681_v22 = vadd.s32 %v1757_v21, %v1914_v29  ;;  %v826_v37 = vmul.f32 %v772_v16, %v772_v16 }
 0x172   : > { %633 = vst [vmem:[%s1817_s16 + $0xa8] sm:$0xff] %v609_v17  ;;  %v682_v25 = vadd.s32 %v1757_v21, %v657_v5 }
 0x173   : > { %v794_v0 = vadd.f32 %v793_v11, %v771_v53  ;;  %v847_v18 = vadd.f32 %v846_v40, %v824_v10 }
 0x175   : > { %v848_v23 = vadd.f32 %v847_v18, %v825_v14  ;;  %v795_v24 = vadd.f32 %v794_v0, %v772_v16 }
 0x176   : > { %1383 = shalt.err (!%p1380_p7)
}
 0x177   : > { %s1384_s12 = scalar_lea.hbm %s1994_s9, 3072  ;;  %s1388_s26 = scalar_lea.hbm %s2150_s3, 9216 }
 0x178   : > { %p1385_p9 = scmp.ne.s32.totalorder %s1994_s9, %s1384_s12  ;;  %p1389_p5 = scmp.lt.u32.totalorder %s1994_s9, %s2150_s3 }
 0x179   : > { %p1390_p10 = scmp.lt.u32.totalorder %s1388_s26, %s1384_s12  ;;  %p1392_p2 = scmp.lt.u32.totalorder %s1384_s12, %s1994_s9 }
 0x17a   : > { %p1386_p12 = pnand %p1385_p9, %p1660_p6 }
 0x17b   : > { %p1391_p1 = por %p1390_p10, %p1389_p5 }
 0x17c   : > { %p1387_p0 = pneg %p1386_p12 }
 0x17d   : > { %p1393_p4 = por %p1392_p2, %p1391_p1 }
 0x17f   : > { %p1394_p8 = pnand %p1393_p4, %p1387_p0 }
 0x181   : > { %1397 = shalt.err (!%p1394_p8)
}
 0x182   : > { %s1508_s17 = smov 128   ;;  %s1509_s29 = smov 8   ;;  %v774_v48 = vsel %vm702_vm1, %v603_v13, 0.0  ;;  %v775_v58 = vsel %vm703_vm2, %v604_v15, 0.0  ;;  %vm704_vm3 = vcmp.lt.s32.totalorder %v680_v33, 512  ;;  %v659_v12 = vadd.s32 168, %v1753_v19 }
 0x183   : > { %1196 = dma.vmem_to_hbm [thread:$0]  (%p1660_p6), %s1976_s13, 3072, %s1994_s9, %s868_s10, %s1508_s17, %s1508_s17, %s1509_s29   ;;  %v827_v28 = vmul.f32 %v773_v20, %v773_v20  ;;  %v796_v29 = vadd.f32 %v795_v24, %v773_v20  ;;  %v849_v31 = vadd.f32 %v848_v23, %v826_v37  ;;  %v683_v32 = vadd.s32 %v1757_v21, %v658_v52 }
 0x184   : > { %vm705_vm4 = vcmp.lt.s32.totalorder %v681_v22, 512  ;;  %v660_v35 = vadd.s32 176, %v1753_v19  ;;  %v828_v59 = vmul.f32 %v774_v48, %v774_v48  ;;  %v829_v13 = vmul.f32 %v775_v58, %v775_v58  ;;  %s1079_s13 = sshll.u32 %s1715_s30, 3  ;;  %s872_s9 = sand.u32 1, %s1563_s22  }
 0x185   : > { %v850_v38 = vadd.f32 %v849_v31, %v827_v28  ;;  %v797_v42 = vadd.f32 %v796_v29, %v774_v48  ;;  %vm706_vm5 = vcmp.lt.s32.totalorder %v682_v25, 512  ;;  %v776_v1 = vsel %vm704_vm3, %v605_v6, 0.0  ;;  %s1114_s10 = sshll.u32 %s1563_s22, 7  ;;  %s280_s14 = scalar_lea.vmem [#allocation9], %s1079_s13 }
 0x186   : > { %v661_v15 = vadd.s32 184, %v1753_v19  ;;  %vm707_vm6 = vcmp.lt.s32.totalorder %v683_v32, 512  ;;  %v684_v46 = vadd.s32 %v1757_v21, %v659_v12  ;;  %v777_v47 = vsel %vm705_vm4, %v606_v61, 0.0  ;;  %s907_s23 = sshll.u32 %s280_s14, 4  ;;  %s2064_s15 = scalar_lea.vmem [#allocation11], %s1079_s13  ;;  %s2072_s23 = int_to_ptr.vmem [resolvable:$true] %s907_s23 }
 0x187   : > { %v798_v39 = vadd.f32 %v797_v42, %v775_v58  ;;  %v851_v45 = vadd.f32 %v850_v38, %v828_v59  ;;  %v685_v27 = vadd.s32 %v1757_v21, %v660_v35  ;;  %v830_v51 = vmul.f32 %v776_v1, %v776_v1  ;;  %s920_s6 = sshll.u32 %s2064_s15, 4  ;;  %s2070_s28 = scalar_lea.hbm %s2151_s4, %s1114_s10  ;;  %s2079_s6 = int_to_ptr.vmem [resolvable:$true] %s920_s6 }
 0x188   : > { %v778_v53 = vsel %vm706_vm5, %v607_v56, 0.0  ;;  %v779_v62 = vsel %vm707_vm6, %v608_v7, 0.0  ;;  %v686_v19 = vadd.s32 %v1757_v21, %v661_v15  ;;  %v831_v55 = vmul.f32 %v777_v47, %v777_v47  ;;  %s2077_s26 = scalar_lea.hbm %s2152_s5, %s1114_s10  ;;  %s2081_s16 = scalar_lea.sflag [#allocation10], %s872_s9 }
 0x189   : > { %v852_v49 = vadd.f32 %v851_v45, %v829_v13  ;;  %v799_v50 = vadd.f32 %v798_v39, %v776_v1  ;;  %vm708_vm7 = vcmp.lt.s32.totalorder %v684_v46, 512  ;;  %vm709_vm8 = vcmp.lt.s32.totalorder %v685_v27, 512  ;;  %s1398_s11 = scalar_lea.vmem %s2072_s23, 128  ;;  %s1510_s17 = smov [#allocation9]  }
 0x18a   : > { %v832_v43 = vmul.f32 %v778_v53, %v778_v53  ;;  %v833_v26 = vmul.f32 %v779_v62, %v779_v62  ;;  %v780_v41 = vsel %vm708_vm7, %v609_v17, 0.0  ;;  %vm710_vm9 = vcmp.lt.s32.totalorder %v686_v19, 512  ;;  %p1399_p11 = scmp.ne.s32.totalorder %s2072_s23, %s1398_s11  ;;  %s1402_s29 = sshll.u32 %s1510_s17, 4  ;;  %s1403_s29 = int_to_ptr.vmem [resolvable:$false] %s1402_s29 }
 0x18b   : > { %v800_v57 = vadd.f32 %v799_v50, %v777_v47  ;;  %v853_v34 = vadd.f32 %v852_v49, %v830_v51  ;;  %v781_v56 = vsel %vm709_vm8, %v610_v3, 0.0  ;;  %v834_v36 = vmul.f32 %v780_v41, %v780_v41  ;;  %s1404_s13 = scalar_lea.vmem %s1403_s29, 256  ;;  %p1405_p7 = scmp.lt.s32.totalorder %s2072_s23, %s1403_s29 }
 0x18c   : > { %v782_v2 = vsel %vm710_vm9, %v611_v8, 0.0  ;;  %v835_v4 = vmul.f32 %v781_v56, %v781_v56  ;;  %p1400_p13 = pnand %p1399_p11, %p1660_p6  ;;  %p1406_p9 = scmp.lt.s32.totalorder %s1404_s13, %s1398_s11 }
 0x18d   : > { %v854_v61 = vadd.f32 %v853_v34, %v831_v55  ;;  %v801_v54 = vadd.f32 %v800_v57, %v778_v53  ;;  %v836_v9 = vmul.f32 %v782_v2, %v782_v2 }
 0x18e   : > { %p1401_p3 = pneg %p1400_p13  ;;  %p1407_p12 = por %p1406_p9, %p1405_p7 }
 0x18f   : > { %v802_v6 = vadd.f32 %v801_v54, %v779_v62  ;;  %v855_v30 = vadd.f32 %v854_v61, %v832_v43 }
 0x190   : > { %p1408_p0 = pnand %p1407_p12, %p1401_p3 }
 0x191   : > { %v856_v21 = vadd.f32 %v855_v30, %v833_v26  ;;  %v803_v60 = vadd.f32 %v802_v6, %v780_v41 }
 0x193   : > { %v804_v5 = vadd.f32 %v803_v60, %v781_v56  ;;  %v857_v7 = vadd.f32 %v856_v21, %v834_v36 }
 0x195   : > { %v805_v10 = vadd.f32 %v804_v5, %v782_v2  ;;  %v858_v40 = vadd.f32 %v857_v7, %v835_v4 }
 0x197   : > { %v806_v11 = vrot.slane %v805_v10, 4  ;;  %v859_v14 = vadd.f32 %v858_v40, %v836_v9 }
 0x199   : > { %v807_v16 = vadd.f32 %v806_v11, %v805_v10  ;;  %v860_v63 = vrot.slane %v859_v14, 4 }
 0x19b   : > { %v808_v3 = vrot.slane %v807_v16, 2  ;;  %v861_v33 = vadd.f32 %v860_v63, %v859_v14 }
 0x19d   : > { %v809_v17 = vadd.f32 %v808_v3, %v807_v16  ;;  %v862_v0 = vrot.slane %v861_v33, 2 }
 0x19f   : > { %v863_v44 = vadd.f32 %v862_v0, %v861_v33  ;;  %v810_v8 = vrot.slane %v809_v17, 1 }
 0x1a1   : > { %v811_v18 = vadd.f32 %v810_v8, %v809_v17  ;;  %v864_v52 = vrot.slane %v863_v44, 1 }
 0x1a3   : > { %812 = vst [vmem:[%s280_s14] sm:$0xff] %v811_v18  ;;  %v865_v20 = vadd.f32 %v864_v52, %v863_v44 }
 0x1a4   : > { %1411 = shalt.err (!%p1408_p0)
}
 0x1a5   : > { %s1412_s9 = scalar_lea.hbm %s2070_s28, 128  ;;  %s1416_s12 = scalar_lea.hbm %s2151_s4, 384 }
 0x1a6   : > { %p1413_p5 = scmp.ne.s32.totalorder %s2070_s28, %s1412_s9  ;;  %p1417_p2 = scmp.lt.u32.totalorder %s2070_s28, %s2151_s4 }
 0x1a7   : > { %p1418_p4 = scmp.lt.u32.totalorder %s1416_s12, %s1412_s9  ;;  %p1420_p11 = scmp.lt.u32.totalorder %s1412_s9, %s2070_s28 }
 0x1a8   : > { %p1414_p10 = pnand %p1413_p5, %p1660_p6 }
 0x1a9   : > { %p1419_p8 = por %p1418_p4, %p1417_p2 }
 0x1aa   : > { %p1415_p1 = pneg %p1414_p10 }
 0x1ab   : > { %p1421_p13 = por %p1420_p11, %p1419_p8 }
 0x1ad   : > { %p1422_p3 = pnand %p1421_p13, %p1415_p1 }
 0x1af   : > { %1425 = shalt.err (!%p1422_p3)
}
 0x1b0   : > { %1197 = dma.vmem_to_hbm [thread:$0]  (%p1660_p6), %s2072_s23, 128, %s2070_s28, %s2081_s16   ;;  %866 = vst [vmem:[%s2064_s15] sm:$0xff] %v865_v20 }
 0x1b1   : > { %s1426_s24 = scalar_lea.vmem %s2079_s6, 128  ;;  %s1511_s11 = smov [#allocation11]  }
 0x1b2   : > { %p1427_p7 = scmp.ne.s32.totalorder %s2079_s6, %s1426_s24  ;;  %s1430_s17 = sshll.u32 %s1511_s11, 4  ;;  %s1431_s17 = int_to_ptr.vmem [resolvable:$false] %s1430_s17 }
 0x1b3   : > { %s1432_s29 = scalar_lea.vmem %s1431_s17, 256  ;;  %p1433_p0 = scmp.lt.s32.totalorder %s2079_s6, %s1431_s17 }
 0x1b4   : > { %p1428_p9 = pnand %p1427_p7, %p1660_p6  ;;  %p1434_p5 = scmp.lt.s32.totalorder %s1432_s29, %s1426_s24 }
 0x1b6   : > { %p1429_p12 = pneg %p1428_p9  ;;  %p1435_p10 = por %p1434_p5, %p1433_p0 }
 0x1b8   : > { %p1436_p1 = pnand %p1435_p10, %p1429_p12 }
 0x1ba   : > { %1439 = shalt.err (!%p1436_p1)
}
 0x1bb   : > { %s1440_s23 = scalar_lea.hbm %s2077_s26, 128  ;;  %s1444_s13 = scalar_lea.hbm %s2152_s5, 384 }
 0x1bc   : > { %p1441_p2 = scmp.ne.s32.totalorder %s2077_s26, %s1440_s23  ;;  %p1445_p11 = scmp.lt.u32.totalorder %s2077_s26, %s2152_s5 }
 0x1bd   : > { %p1446_p13 = scmp.lt.u32.totalorder %s1444_s13, %s1440_s23  ;;  %p1448_p7 = scmp.lt.u32.totalorder %s1440_s23, %s2077_s26 }
 0x1be   : > { %p1442_p4 = pnand %p1441_p2, %p1660_p6 }
 0x1bf   : > { %p1447_p3 = por %p1446_p13, %p1445_p11 }
 0x1c0   : > { %p1443_p8 = pneg %p1442_p4 }
 0x1c1   : > { %p1449_p9 = por %p1448_p7, %p1447_p3 }
 0x1c3   : > { %p1450_p12 = pnand %p1449_p9, %p1443_p8 }
 0x1c5   : > { %1453 = shalt.err (!%p1450_p12)
}
 0x1c6   : > { %1198 = dma.vmem_to_hbm [thread:$0]  (%p1660_p6), %s2079_s6, 128, %s2077_s26, %s2081_s16  }
 0x1c7 PF: > { %p1228_p0 = scmp.ge.s32.totalorder %s1500_s21, 2  ;;  %s932_s14 = sand.u32 1, %s1488_s18  }
 0x1c8   : > { %p2170_p5 = scmp.ne.s32.totalorder %s2159_s25, 0  ;;  %s933_s12 = scalar_lea.sflag [#allocation4], %s932_s14 }
 0x1ca   : > { %p1214_p10 = pnand %p1228_p0, %p2170_p5 }
 0x1cc   : > { %1479 = dma.done.wait (!%p1214_p10), %s933_s12, 3072  }
 0x1cd   : > { %1481 = vsyncadd (!%p1214_p10), %s933_s12, 4294964224  ;;  %s2171_s30 = sadd.s32 4294967294, %s1500_s21  }
 0x1ce   : > { %s941_s22 = sand.u32 1, %s2171_s30  }
 0x1cf   : > { %s942_s24 = scalar_lea.sflag [#allocation10], %s941_s22 }
 0x1d0   : > { %1483 = dma.done.wait (!%p1214_p10), %s942_s24, 256  }
 0x1d1   : > { %1485 = vsyncadd (!%p1214_p10), %s942_s24, 4294967040  ;;  %p23_p6 = scmp.ge.s32.totalorder %s1650_s27, 5   ;;  %s2172_s18 = smov %s1492_s19 }
 0x1d2   : > { %s2173_s19 = smov %s1496_s20  ;;  %s2174_s20 = smov %s1666_s8 }
 0x1d3   : > { %s2175_s21 = smov %s1650_s27  ;;  %25 = sbr.rel (!%p23_p6) target bundleno = 8 (0x8), region = 117 }
 0x1da   :  { %956 = vsyncpa [#allocation3], 1 }
 0x1db   :  { %958 = vsyncpa [#allocation3 + $0x1], 1 }
 0x1dc   :  { %959 = vsyncpa [#allocation6], 1 }
 0x1dd   :  { %960 = vsyncpa [#allocation4], 1 }
 0x1de   :  { %962 = vsyncpa [#allocation4 + $0x1], 1 }
 0x1df   :  { %963 = vsyncpa [#allocation10], 1 }
 0x1e0   :  { %965 = vsyncpa [#allocation10 + $0x1], 1 }

</bundles_post_ra>
